<compile_context>
chip_gen: v5e
topology: v5e:2x2
jax: 0.10.0
libtpu: 0.0.40
codegen_flags: <defaults>
</compile_context>

<pallas_src>
import math
import jax
import jax.numpy as jnp
from jax.experimental import pallas as pl
from jax.experimental.pallas import tpu as pltpu

EPS = 1e-08


# ----------------------------- kernel helpers -------------------------------

def _gln(y, gamma, beta):
    """GlobalLayerNorm over one batch element's (T, C) tile.

    Single-pass statistics (mean & E[x^2]), rsqrt on the EUP, and gamma*inv
    folded into one (1, C) scale before the broadcast multiply.
    """
    mean = jnp.mean(y)
    mean_sq = jnp.mean(y * y)
    var = mean_sq - mean * mean
    inv = jax.lax.rsqrt(var + EPS)
    return (y - mean) * (gamma * inv) + beta


def make_temporal_block_kernel(kernel_size, padding, dilation, matmul_dtype):
    def mm(a, w):
        # f32 accumulation always; operands optionally bf16 on v6e/v7x.
        return jnp.dot(a.astype(matmul_dtype), w.astype(matmul_dtype),
                       preferred_element_type=jnp.float32)

    def kernel(x_ref, w1_ref, a1_ref, g1_ref, b1_ref,
               dw_ref, a2_ref, g2_ref, b2_ref, w2_ref, o_ref):
        x = x_ref[0]                       # (T, Cin) — this grid step's batch element
        T = x.shape[0]

        # conv1x1 (Cin -> Cout, no bias) + PReLU + gLN
        h = mm(x, w1_ref[...])             # (T, Cout)
        h = jnp.where(h > 0, h, a1_ref[0] * h)
        h = _gln(h, g1_ref[...], b1_ref[...])

        # depthwise conv1d (K taps, stride 1, zero padding, dilation) via XLU
        # sublane rolls + boundary masking. tap[t] = h[t + s], s = k*dil - pad.
        row = jax.lax.broadcasted_iota(jnp.int32, (T, 1), 0)
        acc = jnp.zeros_like(h)
        for k in range(kernel_size):
            s = k * dilation - padding     # static Python int
            if s == 0:
                tap = h
            else:
                tap = pltpu.roll(h, shift=(-s) % T, axis=0)
                valid = (row + s >= 0) & (row + s < T)
                tap = jnp.where(valid, tap, 0.0)
            acc = acc + dw_ref[k:k + 1, :] * tap

        # PReLU + gLN
        h = jnp.where(acc > 0, acc, a2_ref[0] * acc)
        h = _gln(h, g2_ref[...], b2_ref[...])

        # pointwise conv (Cout -> Cin, no bias) + residual
        o_ref[0] = x + mm(h, w2_ref[...])

    return kernel


# ----------------------------- wrapper ---------------------------------------

def temporal_block(x, p, *, kernel_size, stride, padding, dilation,
                   matmul_dtype=jnp.float32):
    """x: (B, T, Cin) channels-last f32. Returns (B, T, Cin)."""
    B, T, C_in = x.shape
    C_out = p["w1"].shape[1]
    assert stride == 1, "residual connection requires stride == 1"
    assert 2 * padding == dilation * (kernel_size - 1), \
        "residual connection requires same-length depthwise conv output"

    kern = make_temporal_block_kernel(kernel_size, padding, dilation, matmul_dtype)

    def rep(shape):  # weight replicated across all grid steps
        return pl.BlockSpec(shape, lambda b, _n=len(shape): (0,) * _n)

    smem = pl.BlockSpec(memory_space=pltpu.MemorySpace.SMEM)

    return pl.pallas_call(
        kern,
        out_shape=jax.ShapeDtypeStruct((B, T, C_in), jnp.float32),
        grid=(B,),
        in_specs=[
            pl.BlockSpec((1, T, C_in), lambda b: (b, 0, 0)),    # x
            rep((C_in, C_out)),                                  # conv1x1 weight (Cin, Cout)
            smem,                                                # PReLU slope 1 (1,)
            rep((1, C_out)), rep((1, C_out)),                    # gLN1 gamma / beta
            rep((kernel_size, C_out)),                           # depthwise taps (K, Cout)
            smem,                                                # PReLU slope 2 (1,)
            rep((1, C_out)), rep((1, C_out)),                    # gLN2 gamma / beta
            rep((C_out, C_in)),                                  # pointwise weight (Cout, Cin)
        ],
        out_specs=pl.BlockSpec((1, T, C_in), lambda b: (b, 0, 0)),
        compiler_params=pltpu.CompilerParams(
            dimension_semantics=("parallel",)),  # batch is independent -> both TCs on v7x
    )(x, p["w1"], p["a1"], p["g1"], p["b1"],
      p["dw"], p["a2"], p["g2"], p["b2"], p["w2"])


# ----------------------------- params ----------------------------------------

def init_params(key, C_in, C_out, kernel_size):
    """Channels-last weights (PyTorch NCT conv weights transposed once on host)."""
    k1, k2, k3 = jax.random.split(key, 3)
    return dict(
        w1=jax.random.normal(k1, (C_in, C_out), jnp.float32) / math.sqrt(C_in),
        a1=jnp.full((1,), 0.25, jnp.float32),                    # PReLU default slope
        g1=jnp.ones((1, C_out), jnp.float32),
        b1=jnp.zeros((1, C_out), jnp.float32),
        dw=jax.random.normal(k2, (kernel_size, C_out), jnp.float32) / math.sqrt(kernel_size),
        a2=jnp.full((1,), 0.25, jnp.float32),
        g2=jnp.ones((1, C_out), jnp.float32),
        b2=jnp.zeros((1, C_out), jnp.float32),
        w2=jax.random.normal(k3, (C_out, C_in), jnp.float32) / math.sqrt(C_out),
    )


# ----------------------------- pure-JAX reference -----------------------------

def _gln_ref(y, gamma, beta):
    mean = jnp.mean(y, axis=(1, 2), keepdims=True)
    var = jnp.mean((y - mean) ** 2, axis=(1, 2), keepdims=True)
    return gamma * (y - mean) / jnp.sqrt(var + EPS) + beta


def temporal_block_ref(x, p, *, kernel_size, padding, dilation):
    T = x.shape[1]
    h = jnp.einsum("btc,co->bto", x, p["w1"], precision="highest")
    h = jnp.where(h > 0, h, p["a1"][0] * h)
    h = _gln_ref(h, p["g1"], p["b1"])
    hp = jnp.pad(h, ((0, 0), (padding, padding), (0, 0)))
    acc = sum(p["dw"][k] * hp[:, k * dilation:k * dilation + T]
              for k in range(kernel_size))
    h = jnp.where(acc > 0, acc, p["a2"][0] * acc)
    h = _gln_ref(h, p["g2"], p["b2"])
    out = jnp.einsum("bto,oc->btc", h, p["w2"], precision="highest")
    return x + out


# ----------------------------- main -------------------------------------------

if __name__ == "__main__":
    B, T = 2, 64                 # small batch / sequence
    C_in, C_out = 128, 256       # in_channels / out_channels
    K, STRIDE, PAD, DIL = 3, 1, 1, 1
    # Set to jnp.bfloat16 on v6e/v7x for ~2-4x MXU throughput (loosen tolerance).
    MATMUL_DTYPE = jnp.float32

    key = jax.random.PRNGKey(0)
    kx, kp = jax.random.split(key)
    x = jax.random.normal(kx, (B, T, C_in), jnp.float32)
    params = init_params(kp, C_in, C_out, K)

    out = temporal_block(x, params, kernel_size=K, stride=STRIDE, padding=PAD,
                         dilation=DIL, matmul_dtype=MATMUL_DTYPE)
    out = jax.block_until_ready(out)

    ref = jax.block_until_ready(
        temporal_block_ref(x, params, kernel_size=K, padding=PAD, dilation=DIL))

    assert out.shape == (B, T, C_in)
    assert bool(jnp.all(jnp.isfinite(out)))
    max_err = float(jnp.max(jnp.abs(out - ref)))
    assert jnp.allclose(out, ref, rtol=1e-2, atol=1e-2), max_err
    print("KERNEL_OK")
</pallas_src>

<mosaic_0001>
module attributes {stable_mosaic.version = 11 : i64} {
  func.func @kernel(%arg0: i32, %arg1: memref<1x64x128xf32, #tpu.memory_space<vmem>>, %arg2: memref<128x256xf32, #tpu.memory_space<vmem>>, %arg3: memref<1xf32, #tpu.memory_space<smem>>, %arg4: memref<1x256xf32, #tpu.memory_space<vmem>>, %arg5: memref<1x256xf32, #tpu.memory_space<vmem>>, %arg6: memref<3x256xf32, #tpu.memory_space<vmem>>, %arg7: memref<1xf32, #tpu.memory_space<smem>>, %arg8: memref<1x256xf32, #tpu.memory_space<vmem>>, %arg9: memref<1x256xf32, #tpu.memory_space<vmem>>, %arg10: memref<256x128xf32, #tpu.memory_space<vmem>>, %arg11: memref<1x64x128xf32, #tpu.memory_space<vmem>>) attributes {dimension_semantics = [#tpu.dimension_semantics<parallel>], iteration_bounds = array<i64: 2>, scalar_prefetch = 0 : i64, scratch_operands = 0 : i64, tpu.core_type = #tpu.core_type<tc>, window_params = [{transform_indices = @transform_0, window_bounds = array<i64: 1, 64, 128>}, {pipeline_mode = #tpu.pipeline_mode<synchronous>, transform_indices = @transform_1, window_bounds = array<i64: 128, 256>}, {transform_indices = @transform_2, window_bounds = array<i64: 1>}, {pipeline_mode = #tpu.pipeline_mode<synchronous>, transform_indices = @transform_3, window_bounds = array<i64: 1, 256>}, {pipeline_mode = #tpu.pipeline_mode<synchronous>, transform_indices = @transform_4, window_bounds = array<i64: 1, 256>}, {pipeline_mode = #tpu.pipeline_mode<synchronous>, transform_indices = @transform_5, window_bounds = array<i64: 3, 256>}, {transform_indices = @transform_6, window_bounds = array<i64: 1>}, {pipeline_mode = #tpu.pipeline_mode<synchronous>, transform_indices = @transform_7, window_bounds = array<i64: 1, 256>}, {pipeline_mode = #tpu.pipeline_mode<synchronous>, transform_indices = @transform_8, window_bounds = array<i64: 1, 256>}, {pipeline_mode = #tpu.pipeline_mode<synchronous>, transform_indices = @transform_9, window_bounds = array<i64: 256, 128>}, {transform_indices = @transform_10, window_bounds = array<i64: 1, 64, 128>}]} {
    %c0 = arith.constant 0 : index
    %c0_0 = arith.constant 0 : index
    %c0_1 = arith.constant 0 : index
    %0 = vector.load %arg1[%c0, %c0_0, %c0_1] : memref<1x64x128xf32, #tpu.memory_space<vmem>>, vector<1x64x128xf32>
    %1 = vector.shape_cast %0 : vector<1x64x128xf32> to vector<64x128xf32>
    %c0_2 = arith.constant 0 : index
    %c0_3 = arith.constant 0 : index
    %2 = vector.load %arg2[%c0_2, %c0_3] : memref<128x256xf32, #tpu.memory_space<vmem>>, vector<128x256xf32>
    %cst = arith.constant dense<0.000000e+00> : vector<64x256xf32>
    %3 = tpu.matmul %1, %2, %cst {dimension_numbers = #tpu.dot_dimension_numbers<[1], [0], [0], [1], [0, 0, 1, 1], [], []>} : vector<64x128xf32>, vector<128x256xf32>, vector<64x256xf32> -> vector<64x256xf32>
    %cst_4 = arith.constant 0.000000e+00 : f32
    %4 = vector.broadcast %cst_4 : f32 to vector<64x256xf32>
    %5 = arith.cmpf ogt, %3, %4 : vector<64x256xf32>
    %c0_5 = arith.constant 0 : index
    %6 = memref.load %arg3[%c0_5] : memref<1xf32, #tpu.memory_space<smem>>
    %7 = vector.broadcast %6 : f32 to vector<64x256xf32>
    %8 = arith.mulf %7, %3 : vector<64x256xf32>
    %9 = arith.select %5, %3, %8 : vector<64x256xi1>, vector<64x256xf32>
    %c0_6 = arith.constant 0 : index
    %c0_7 = arith.constant 0 : index
    %10 = vector.load %arg4[%c0_6, %c0_7] : memref<1x256xf32, #tpu.memory_space<vmem>>, vector<1x256xf32>
    %c0_8 = arith.constant 0 : index
    %c0_9 = arith.constant 0 : index
    %11 = vector.load %arg5[%c0_8, %c0_9] : memref<1x256xf32, #tpu.memory_space<vmem>>, vector<1x256xf32>
    %12 = vector.shape_cast %9 : vector<64x256xf32> to vector<1x64x256xf32>
    %cst_10 = arith.constant dense<0.000000e+00> : vector<1xf32>
    %13 = vector.multi_reduction <add>, %12, %cst_10 [1, 2] : vector<1x64x256xf32> to vector<1xf32>
    %14 = vector.shape_cast %13 : vector<1xf32> to vector<1x1x1xf32>
    %15 = vector.extract %14[0, 0, 0] : f32 from vector<1x1x1xf32>
    %cst_11 = arith.constant 1.638400e+04 : f32
    %16 = arith.divf %15, %cst_11 : f32
    %17 = arith.mulf %9, %9 : vector<64x256xf32>
    %18 = vector.shape_cast %17 : vector<64x256xf32> to vector<1x64x256xf32>
    %cst_12 = arith.constant dense<0.000000e+00> : vector<1xf32>
    %19 = vector.multi_reduction <add>, %18, %cst_12 [1, 2] : vector<1x64x256xf32> to vector<1xf32>
    %20 = vector.shape_cast %19 : vector<1xf32> to vector<1x1x1xf32>
    %21 = vector.extract %20[0, 0, 0] : f32 from vector<1x1x1xf32>
    %cst_13 = arith.constant 1.638400e+04 : f32
    %22 = arith.divf %21, %cst_13 : f32
    %23 = arith.mulf %16, %16 : f32
    %24 = arith.subf %22, %23 : f32
    %cst_14 = arith.constant 9.99999993E-9 : f32
    %25 = arith.addf %24, %cst_14 : f32
    %26 = math.rsqrt %25 : f32
    %27 = vector.broadcast %16 : f32 to vector<64x256xf32>
    %28 = arith.subf %9, %27 : vector<64x256xf32>
    %29 = vector.broadcast %26 : f32 to vector<1x256xf32>
    %30 = arith.mulf %10, %29 : vector<1x256xf32>
    %31 = vector.broadcast %30 : vector<1x256xf32> to vector<64x256xf32>
    %32 = arith.mulf %28, %31 : vector<64x256xf32>
    %33 = vector.broadcast %11 : vector<1x256xf32> to vector<64x256xf32>
    %34 = arith.addf %32, %33 : vector<64x256xf32>
    %35 = tpu.iota {dimensions = array<i32: 0>} : vector<64x1xi32>
    %cst_15 = arith.constant 0.000000e+00 : f32
    %36 = vector.broadcast %cst_15 : f32 to vector<64x256xf32>
    %c1_i32 = arith.constant 1 : i32
    %37 = tpu.dynamic_rotate %34 by %c1_i32 dim 0 : vector<64x256xf32>, i32 -> vector<64x256xf32>
    %c-1_i32 = arith.constant -1 : i32
    %38 = vector.broadcast %c-1_i32 : i32 to vector<64x1xi32>
    %39 = arith.addi %35, %38 : vector<64x1xi32>
    %c0_i32 = arith.constant 0 : i32
    %40 = vector.broadcast %c0_i32 : i32 to vector<64x1xi32>
    %41 = arith.cmpi sge, %39, %40 : vector<64x1xi32>
    %c-1_i32_16 = arith.constant -1 : i32
    %42 = vector.broadcast %c-1_i32_16 : i32 to vector<64x1xi32>
    %43 = arith.addi %35, %42 : vector<64x1xi32>
    %c64_i32 = arith.constant 64 : i32
    %44 = vector.broadcast %c64_i32 : i32 to vector<64x1xi32>
    %45 = arith.cmpi slt, %43, %44 : vector<64x1xi32>
    %46 = arith.andi %41, %45 : vector<64x1xi1>
    %cst_17 = arith.constant 0.000000e+00 : f32
    %47 = vector.shape_cast %46 : vector<64x1xi1> to vector<64x1xi1>
    %48 = vector.broadcast %47 : vector<64x1xi1> to vector<64x256xi1>
    %49 = vector.broadcast %cst_17 : f32 to vector<64x256xf32>
    %50 = arith.select %48, %37, %49 : vector<64x256xi1>, vector<64x256xf32>
    %c0_18 = arith.constant 0 : index
    %c0_19 = arith.constant 0 : index
    %51 = vector.load %arg6[%c0_18, %c0_19] : memref<3x256xf32, #tpu.memory_space<vmem>>, vector<1x256xf32>
    %52 = vector.broadcast %51 : vector<1x256xf32> to vector<64x256xf32>
    %53 = arith.mulf %52, %50 : vector<64x256xf32>
    %54 = arith.addf %36, %53 : vector<64x256xf32>
    %c1 = arith.constant 1 : index
    %c0_20 = arith.constant 0 : index
    %55 = vector.load %arg6[%c1, %c0_20] : memref<3x256xf32, #tpu.memory_space<vmem>>, vector<1x256xf32>
    %56 = vector.broadcast %55 : vector<1x256xf32> to vector<64x256xf32>
    %57 = arith.mulf %56, %34 : vector<64x256xf32>
    %58 = arith.addf %54, %57 : vector<64x256xf32>
    %c63_i32 = arith.constant 63 : i32
    %59 = tpu.dynamic_rotate %34 by %c63_i32 dim 0 : vector<64x256xf32>, i32 -> vector<64x256xf32>
    %c1_i32_21 = arith.constant 1 : i32
    %60 = vector.broadcast %c1_i32_21 : i32 to vector<64x1xi32>
    %61 = arith.addi %35, %60 : vector<64x1xi32>
    %c0_i32_22 = arith.constant 0 : i32
    %62 = vector.broadcast %c0_i32_22 : i32 to vector<64x1xi32>
    %63 = arith.cmpi sge, %61, %62 : vector<64x1xi32>
    %c1_i32_23 = arith.constant 1 : i32
    %64 = vector.broadcast %c1_i32_23 : i32 to vector<64x1xi32>
    %65 = arith.addi %35, %64 : vector<64x1xi32>
    %c64_i32_24 = arith.constant 64 : i32
    %66 = vector.broadcast %c64_i32_24 : i32 to vector<64x1xi32>
    %67 = arith.cmpi slt, %65, %66 : vector<64x1xi32>
    %68 = arith.andi %63, %67 : vector<64x1xi1>
    %cst_25 = arith.constant 0.000000e+00 : f32
    %69 = vector.shape_cast %68 : vector<64x1xi1> to vector<64x1xi1>
    %70 = vector.broadcast %69 : vector<64x1xi1> to vector<64x256xi1>
    %71 = vector.broadcast %cst_25 : f32 to vector<64x256xf32>
    %72 = arith.select %70, %59, %71 : vector<64x256xi1>, vector<64x256xf32>
    %c2 = arith.constant 2 : index
    %c0_26 = arith.constant 0 : index
    %73 = vector.load %arg6[%c2, %c0_26] : memref<3x256xf32, #tpu.memory_space<vmem>>, vector<1x256xf32>
    %74 = vector.broadcast %73 : vector<1x256xf32> to vector<64x256xf32>
    %75 = arith.mulf %74, %72 : vector<64x256xf32>
    %76 = arith.addf %58, %75 : vector<64x256xf32>
    %cst_27 = arith.constant 0.000000e+00 : f32
    %77 = vector.broadcast %cst_27 : f32 to vector<64x256xf32>
    %78 = arith.cmpf ogt, %76, %77 : vector<64x256xf32>
    %c0_28 = arith.constant 0 : index
    %79 = memref.load %arg7[%c0_28] : memref<1xf32, #tpu.memory_space<smem>>
    %80 = vector.broadcast %79 : f32 to vector<64x256xf32>
    %81 = arith.mulf %80, %76 : vector<64x256xf32>
    %82 = arith.select %78, %76, %81 : vector<64x256xi1>, vector<64x256xf32>
    %c0_29 = arith.constant 0 : index
    %c0_30 = arith.constant 0 : index
    %83 = vector.load %arg8[%c0_29, %c0_30] : memref<1x256xf32, #tpu.memory_space<vmem>>, vector<1x256xf32>
    %c0_31 = arith.constant 0 : index
    %c0_32 = arith.constant 0 : index
    %84 = vector.load %arg9[%c0_31, %c0_32] : memref<1x256xf32, #tpu.memory_space<vmem>>, vector<1x256xf32>
    %85 = vector.shape_cast %82 : vector<64x256xf32> to vector<1x64x256xf32>
    %cst_33 = arith.constant dense<0.000000e+00> : vector<1xf32>
    %86 = vector.multi_reduction <add>, %85, %cst_33 [1, 2] : vector<1x64x256xf32> to vector<1xf32>
    %87 = vector.shape_cast %86 : vector<1xf32> to vector<1x1x1xf32>
    %88 = vector.extract %87[0, 0, 0] : f32 from vector<1x1x1xf32>
    %cst_34 = arith.constant 1.638400e+04 : f32
    %89 = arith.divf %88, %cst_34 : f32
    %90 = arith.mulf %82, %82 : vector<64x256xf32>
    %91 = vector.shape_cast %90 : vector<64x256xf32> to vector<1x64x256xf32>
    %cst_35 = arith.constant dense<0.000000e+00> : vector<1xf32>
    %92 = vector.multi_reduction <add>, %91, %cst_35 [1, 2] : vector<1x64x256xf32> to vector<1xf32>
    %93 = vector.shape_cast %92 : vector<1xf32> to vector<1x1x1xf32>
    %94 = vector.extract %93[0, 0, 0] : f32 from vector<1x1x1xf32>
    %cst_36 = arith.constant 1.638400e+04 : f32
    %95 = arith.divf %94, %cst_36 : f32
    %96 = arith.mulf %89, %89 : f32
    %97 = arith.subf %95, %96 : f32
    %cst_37 = arith.constant 9.99999993E-9 : f32
    %98 = arith.addf %97, %cst_37 : f32
    %99 = math.rsqrt %98 : f32
    %100 = vector.broadcast %89 : f32 to vector<64x256xf32>
    %101 = arith.subf %82, %100 : vector<64x256xf32>
    %102 = vector.broadcast %99 : f32 to vector<1x256xf32>
    %103 = arith.mulf %83, %102 : vector<1x256xf32>
    %104 = vector.broadcast %103 : vector<1x256xf32> to vector<64x256xf32>
    %105 = arith.mulf %101, %104 : vector<64x256xf32>
    %106 = vector.broadcast %84 : vector<1x256xf32> to vector<64x256xf32>
    %107 = arith.addf %105, %106 : vector<64x256xf32>
    %c0_38 = arith.constant 0 : index
    %c0_39 = arith.constant 0 : index
    %108 = vector.load %arg10[%c0_38, %c0_39] : memref<256x128xf32, #tpu.memory_space<vmem>>, vector<256x128xf32>
    %cst_40 = arith.constant dense<0.000000e+00> : vector<64x128xf32>
    %109 = tpu.matmul %107, %108, %cst_40 {dimension_numbers = #tpu.dot_dimension_numbers<[1], [0], [0], [1], [0, 0, 1, 1], [], []>} : vector<64x256xf32>, vector<256x128xf32>, vector<64x128xf32> -> vector<64x128xf32>
    %110 = arith.addf %1, %109 : vector<64x128xf32>
    %c0_41 = arith.constant 0 : index
    %c0_42 = arith.constant 0 : index
    %c0_43 = arith.constant 0 : index
    %111 = vector.load %arg11[%c0_41, %c0_42, %c0_43] : memref<1x64x128xf32, #tpu.memory_space<vmem>>, vector<1x64x128xf32>
    %112 = vector.shape_cast %111 : vector<1x64x128xf32> to vector<64x128xf32>
    %113 = vector.shape_cast %110 : vector<64x128xf32> to vector<1x64x128xf32>
    tpu.vector_store %arg11[%c0_41, %c0_42, %c0_43], %113 {strides = array<i32>} : memref<1x64x128xf32, #tpu.memory_space<vmem>>, vector<1x64x128xf32>,
    return
  }
  func.func @transform_0(%arg0: i32) -> (i32, i32, i32) {
    %c0_i32 = arith.constant 0 : i32
    %c0_i32_0 = arith.constant 0 : i32
    %c0_i32_1 = arith.constant 0 : i32
    return %arg0, %c0_i32, %c0_i32_0 : i32, i32, i32
  }
  func.func @transform_1(%arg0: i32) -> (i32, i32) {
    %c0_i32 = arith.constant 0 : i32
    %c0_i32_0 = arith.constant 0 : i32
    %c0_i32_1 = arith.constant 0 : i32
    return %c0_i32, %c0_i32_0 : i32, i32
  }
  func.func @transform_2(%arg0: i32) -> i32 {
    %c0_i32 = arith.constant 0 : i32
    %c0_i32_0 = arith.constant 0 : i32
    return %c0_i32 : i32
  }
  func.func @transform_3(%arg0: i32) -> (i32, i32) {
    %c0_i32 = arith.constant 0 : i32
    %c0_i32_0 = arith.constant 0 : i32
    %c0_i32_1 = arith.constant 0 : i32
    return %c0_i32, %c0_i32_0 : i32, i32
  }
  func.func @transform_4(%arg0: i32) -> (i32, i32) {
    %c0_i32 = arith.constant 0 : i32
    %c0_i32_0 = arith.constant 0 : i32
    %c0_i32_1 = arith.constant 0 : i32
    return %c0_i32, %c0_i32_0 : i32, i32
  }
  func.func @transform_5(%arg0: i32) -> (i32, i32) {
    %c0_i32 = arith.constant 0 : i32
    %c0_i32_0 = arith.constant 0 : i32
    %c0_i32_1 = arith.constant 0 : i32
    return %c0_i32, %c0_i32_0 : i32, i32
  }
  func.func @transform_6(%arg0: i32) -> i32 {
    %c0_i32 = arith.constant 0 : i32
    %c0_i32_0 = arith.constant 0 : i32
    return %c0_i32 : i32
  }
  func.func @transform_7(%arg0: i32) -> (i32, i32) {
    %c0_i32 = arith.constant 0 : i32
    %c0_i32_0 = arith.constant 0 : i32
    %c0_i32_1 = arith.constant 0 : i32
    return %c0_i32, %c0_i32_0 : i32, i32
  }
  func.func @transform_8(%arg0: i32) -> (i32, i32) {
    %c0_i32 = arith.constant 0 : i32
    %c0_i32_0 = arith.constant 0 : i32
    %c0_i32_1 = arith.constant 0 : i32
    return %c0_i32, %c0_i32_0 : i32, i32
  }
  func.func @transform_9(%arg0: i32) -> (i32, i32) {
    %c0_i32 = arith.constant 0 : i32
    %c0_i32_0 = arith.constant 0 : i32
    %c0_i32_1 = arith.constant 0 : i32
    return %c0_i32, %c0_i32_0 : i32, i32
  }
  func.func @transform_10(%arg0: i32) -> (i32, i32, i32) {
    %c0_i32 = arith.constant 0 : i32
    %c0_i32_0 = arith.constant 0 : i32
    %c0_i32_1 = arith.constant 0 : i32
    return %arg0, %c0_i32, %c0_i32_0 : i32, i32, i32
  }
}

</mosaic_0001>

<bundles_post_ra>
// kernel: tpu_custom_call.1
= control target key start
LH: loop header
LB: loop body
LE: loop exit
PB: predicated region body
PF: predicated region fallthrough
CT: control target
= control target key end

     0   :  { %s2642_s0 = inlined_call_operand.hbm [shape: f32[2,64,128], index: 0, kind: input, shape index: {}]   ;;  %s2643_s1 = inlined_call_operand.hbm [shape: f32[128,256], index: 1, kind: input, shape index: {}]   ;;  %s2644_s2 = inlined_call_operand.<no memory space> [shape: f32[1], index: 2, kind: input, shape index: {}]   ;;  %s2645_s3 = inlined_call_operand.vmem [shape: f32[1,256], index: 3, kind: input, shape index: {}]   ;;  %s2646_s4 = inlined_call_operand.vmem [shape: f32[1,256], index: 4, kind: input, shape index: {}]   ;;  %s2647_s5 = inlined_call_operand.hbm [shape: f32[3,256], index: 5, kind: input, shape index: {}]   ;;  %s2648_s6 = inlined_call_operand.<no memory space> [shape: f32[1], index: 6, kind: input, shape index: {}]   ;;  %s2649_s7 = inlined_call_operand.vmem [shape: f32[1,256], index: 7, kind: input, shape index: {}]   ;;  %s2650_s8 = inlined_call_operand.vmem [shape: f32[1,256], index: 8, kind: input, shape index: {}]   ;;  %s2651_s9 = inlined_call_operand.hbm [shape: f32[256,128], index: 9, kind: input, shape index: {}]   ;;  %s2652_s10 = inlined_call_operand.hbm [shape: f32[2,64,128], index: 10, kind: output, shape index: {}]  }
   0x1   :  { %2655 = sst [smem:[#allocation17_spill]] %s2643_s1 }
   0x2   :  { %2656 = sst [smem:[#allocation18_spill]] %s2647_s5 }
   0x3   :  { %15 = sst [smem:[#allocation2]] %s2644_s2 }
   0x4   :  { %16 = sst [smem:[#allocation3]] %s2648_s6 }
   0x5   :  { %17 = vsyncpa [#allocation5], 0 }
   0x6   :  { %19 = vsyncpa [#allocation5 + $0x1], 0 }
   0x7   :  { %20 = vsyncpa [#allocation8], 0 }
   0x8   :  { %21 = vsyncpa [#allocation11], 0 }
   0x9   :  { %22 = vsyncpa [#allocation6], 0 }
   0xa   :  { %24 = vsyncpa [#allocation6 + $0x1], 0  ;;  %s1940_s17 = smov 0   ;;  %s1942_s18 = smov 0  }
   0xb   :  { %s1944_s19 = smov 0   ;;  %s1946_s20 = smov 0  }
   0xc LB: > { %s1961_s2 = sadd.s32 4294967295, %s1867_s20   ;;  %s1539_s6 = sadd.s32 4294967294, %s1867_s20   ;;  %s1867_s20 = sphi %s1946_s20, %s2671_s20   ;;  %s1863_s19 = sphi %s1944_s19, %s2670_s19   ;;  %s1859_s18 = sphi %s1942_s18, %s2669_s18   ;;  %s1855_s17 = sphi %s1940_s17, %s2668_s17  }
   0xd   : > { %p50_p0 = scmp.ne.s32.totalorder %s1859_s18, %s1855_s17  ;;  %p51_p1 = scmp.eq.s32.totalorder %s1961_s2, 0 }
   0xe   : > { %p263_p2 = scmp.eq.s32.totalorder %s1961_s2, 1  ;;  %p269_p3 = scmp.eq.s32.totalorder %s1539_s6, 1 }
   0xf   : > { %p1970_p4 = por %p51_p1, %p50_p0  ;;  %p1540_p5 = scmp.ge.s32.totalorder %s1867_s20, 1 }
  0x10   : > { %p1975_p6 = por %p269_p3, %p50_p0  ;;  %p276_p7 = scmp.lt.s32.totalorder %s1867_s20, 3 }
  0x11   : > { %s2659_s1 = sld [smem:[#allocation17_spill]]  ;;  %s1869_s27 = smov [#allocation7]  }
  0x12   : > { %p1983_p8 = pnand %p1540_p5, %p276_p7  ;;  %s289_s28 = sshll.u32 %s1869_s27, 4  ;;  %s290_s28 = int_to_ptr.vmem [resolvable:$true] %s289_s28 }
  0x13   : > { %s2662_s5 = sld [smem:[#allocation18_spill]]  ;;  %s1870_s13 = smov 256  }
  0x14   : > { %p1591_p9 = pneg %p1983_p8  ;;  %s1871_s14 = smov 16  }
  0x15   : > { %s1872_s15 = smov [#allocation9]   ;;  %s331_s24 = sshll.u32 %s2651_s9, 4  ;;  %s332_s24 = int_to_ptr.hbm [resolvable:$true] %s331_s24 }
  0x16   : > { %p1991_p10 = pnand %p1591_p9, %p51_p1  ;;  %s313_s16 = sshll.u32 %s1872_s15, 4  ;;  %s314_s16 = int_to_ptr.vmem [resolvable:$true] %s313_s16 }
  0x17   : > { %s287_s25 = sshll.u32 %s2659_s1, 4  ;;  %s1873_s27 = smov [#allocation10]   ;;  %s288_s25 = int_to_ptr.hbm [resolvable:$true] %s287_s25 }
  0x18   : > { %1594 = dma.hbm_to_vmem [thread:$0]  (!%p1991_p10), %s288_s25, 4096, %s290_s28, [#allocation8], %s1870_s13, %s1870_s13, %s1871_s14  }
  0x19   : > { %s311_s12 = sshll.u32 %s2662_s5, 4  ;;  %s333_s25 = sshll.u32 %s1873_s27, 4  ;;  %s312_s12 = int_to_ptr.hbm [resolvable:$true] %s311_s12  ;;  %s334_s25 = int_to_ptr.vmem [resolvable:$true] %s333_s25 }
  0x1a   : > { %1597 = dma.hbm_to_vmem [thread:$0]  (!%p1991_p10), %s312_s12, 128, %s314_s16, [#allocation8]  }
  0x1b   : > { %s2653_s28 = smov 128   ;;  %s2654_s30 = smov 8  }
  0x1c   : > { %1600 = dma.hbm_to_vmem [thread:$0]  (!%p1991_p10), %s332_s24, 4096, %s334_s25, [#allocation11], %s2653_s28, %s2653_s28, %s2654_s30  }
  0x1d   : > { %s2012_s11 = sadd.s32 1, %s1867_s20   ;;  %s37_s14 = sadd.s32 1, %s1863_s19 }
  0x1e   : > { %s34_s13 = ssub.s32 %s1867_s20, %s2012_s11  ;;  %p44_p13 = scmp.ne.s32.totalorder %s1863_s19, %s1859_s18 }
  0x1f   : > { %p35_p12 = scmp.eq.s32.totalorder %s34_s13, 0  ;;  %p45_p0 = scmp.eq.s32.totalorder %s1867_s20, 0 }
  0x20   : > { %p2025_p3 = por %p263_p2, %p44_p13  ;;  %p1612_p5 = scmp.lt.s32.totalorder %s1867_s20, 2 }
  0x21   : > { %s2021_s12 = scalar_select %p35_p12, %s1863_s19, %s37_s14  }
  0x22   : > { %s347_s29 = sand.u32 1, %s1863_s19   ;;  %s1559_s16 = sshll.u32 %s1867_s20, 6 }
  0x23   : > { %p46_p7 = por %p45_p0, %p44_p13  ;;  %s1545_s6 = sshll.u32 %s347_s29, 6 }
  0x24   : > { %s356_s27 = scalar_lea.hbm %s2642_s0, %s1559_s16  ;;  %s351_s13 = scalar_lea.vmem [#allocation4], %s1545_s6 }
  0x25   : > { %s357_s25 = sshll.u32 %s356_s27, 4  ;;  %s359_s28 = sshll.u32 %s351_s13, 4  ;;  %s358_s25 = int_to_ptr.hbm [resolvable:$true] %s357_s25  ;;  %s360_s28 = int_to_ptr.vmem [resolvable:$true] %s359_s28 }
  0x26   : > { %p2035_p9 = pnand %p1612_p5, %p46_p7  ;;  %s348_s30 = scalar_lea.sflag [#allocation5], %s347_s29 }
  0x27   : > { %s1763_s1 = sshra.s32 %s358_s25, 4  ;;  %s1770_s6 = scalar_lea.hbm %s2642_s0, 128  ;;  %s1764_s1 = int_to_ptr.hbm [resolvable:$true] %s1763_s1 }
  0x28   : > { %s1765_s5 = scalar_lea.hbm %s1764_s1, 64  ;;  %p1767_p10 = pneg %p2035_p9 }
  0x29   : > { %p1766_p2 = scmp.ne.s32.totalorder %s1764_s1, %s1765_s5  ;;  %p1771_p0 = scmp.lt.s32.totalorder %s1764_s1, %s2642_s0 }
  0x2a   : > { %p1772_p5 = scmp.lt.s32.totalorder %s1770_s6, %s1765_s5 }
  0x2b   : > { %p1768_p12 = pnand %p1767_p10, %p1766_p2 }
  0x2c   : > { %p1773_p7 = por %p1772_p5, %p1771_p0 }
  0x2d   : > { %p1769_p13 = pneg %p1768_p12 }
  0x2f   : > { %p1774_p11 = pnand %p1773_p7, %p1769_p13 }
  0x31   : > { %1777 = shalt.err (!%p1774_p11)
}
  0x32   : > { %s2665_s29 = smov 8   ;;  %s2666_s13 = smov 128  }
  0x33   : > { %1604 = dma.hbm_to_vmem [thread:$0]  (!%p2035_p9), %s358_s25, 1024, %s360_s28, %s348_s30, %s2666_s13, %s2666_s13, %s2665_s29  }
  0x34   : > { %371 = sbr.rel (%p1983_p8) target bundleno = 1089 (0x441), region = 60  ;;  %s2055_s16 = sand.u32 (!%p1983_p8), 1, %s1859_s18  }
  0x35   : > { %s1549_s1 = sshll.u32 (!%p1983_p8), %s2055_s16, 6  ;;  %s374_s5 = scalar_lea.sflag (!%p1983_p8), [#allocation5], %s2055_s16 }
  0x36   : > { %s2061_s23 = scalar_lea.vmem (!%p1983_p8), [#allocation4], %s1549_s1 }
  0x39   : > { %1838 = dma.done.wait (%p1970_p4), %s374_s5, 1024  }
  0x3a   : > { %1840 = vsyncadd (%p1970_p4), %s374_s5, 4294966272 }
  0x3b   : > { %1842 = dma.done.wait (%p51_p1), [#allocation8], 4224  }
  0x3c   : > { %1844 = vsyncadd (%p51_p1), [#allocation8], 4294963072 }
  0x3d   : > { %1846 = dma.done.wait (%p51_p1), [#allocation11], 4096  }
  0x3e   : > { %1848 = vsyncadd (%p51_p1), [#allocation11], 4294963200  ;;  %v468_v0 = vld [vmem:[#allocation7 + $0xf0] sm:$0xff]  ;;  %v469_v1 = vld [vmem:[#allocation7 + $0xf8] sm:$0xff]  ;;  %s568_s21 = sld [smem:[#allocation2]] }
  0x3f   : > { %v466_v2 = vld [vmem:[#allocation7 + $0xe0] sm:$0xff]  ;;  %470 = vmatpush.msra.mxu0 %v468_v0  ;;  %511 = vmatpush.msra.mxu1 %v469_v1  ;;  %v467_v3 = vld [vmem:[#allocation7 + $0xe8] sm:$0xff]  ;;  %v464_v4 = vld [vmem:[#allocation7 + $0xd0] sm:$0xff] }
  0x40   : > { %v465_v5 = vld [vmem:[#allocation7 + $0xd8] sm:$0xff]  ;;  %v462_v6 = vld [vmem:[#allocation7 + $0xc0] sm:$0xff]  ;;  %v463_v7 = vld [vmem:[#allocation7 + $0xc8] sm:$0xff] }
  0x41   : > { %471 = vmatpush.msra.mxu0 %v466_v2  ;;  %512 = vmatpush.msra.mxu1 %v467_v3  ;;  %v460_v8 = vld [vmem:[#allocation7 + $0xb0] sm:$0xff]  ;;  %v461_v9 = vld [vmem:[#allocation7 + $0xb8] sm:$0xff]  ;;  %v458_v10 = vld [vmem:[#allocation7 + $0xa0] sm:$0xff] }
  0x42   : > { %v459_v11 = vld [vmem:[#allocation7 + $0xa8] sm:$0xff]  ;;  %v456_v12 = vld [vmem:[#allocation7 + $0x90] sm:$0xff]  ;;  %v457_v13 = vld [vmem:[#allocation7 + $0x98] sm:$0xff] }
  0x43   : > { %472 = vmatpush.msra.mxu0 %v464_v4  ;;  %513 = vmatpush.msra.mxu1 %v465_v5  ;;  %v454_v14 = vld [vmem:[#allocation7 + $0x80] sm:$0xff]  ;;  %v455_v15 = vld [vmem:[#allocation7 + $0x88] sm:$0xff]  ;;  %v452_v16 = vld [vmem:[#allocation7 + $0x70] sm:$0xff] }
  0x44   : > { %v453_v17 = vld [vmem:[#allocation7 + $0x78] sm:$0xff]  ;;  %v450_v18 = vld [vmem:[#allocation7 + $0x60] sm:$0xff]  ;;  %v451_v19 = vld [vmem:[#allocation7 + $0x68] sm:$0xff]  ;;  %v2083_v44 = vstv %s568_s21 }
  0x45   : > { %473 = vmatpush.msra.mxu0 %v462_v6  ;;  %514 = vmatpush.msra.mxu1 %v463_v7  ;;  %v448_v20 = vld [vmem:[#allocation7 + $0x50] sm:$0xff]  ;;  %v449_v21 = vld [vmem:[#allocation7 + $0x58] sm:$0xff]  ;;  %v446_v22 = vld [vmem:[#allocation7 + $0x40] sm:$0xff] }
  0x46   : > { %v447_v23 = vld [vmem:[#allocation7 + $0x48] sm:$0xff]  ;;  %v444_v24 = vld [vmem:[#allocation7 + $0x30] sm:$0xff]  ;;  %v445_v25 = vld [vmem:[#allocation7 + $0x38] sm:$0xff] }
  0x47   : > { %474 = vmatpush.msra.mxu0 %v460_v8  ;;  %515 = vmatpush.msra.mxu1 %v461_v9  ;;  %v442_v26 = vld [vmem:[#allocation7 + $0x20] sm:$0xff]  ;;  %v443_v27 = vld [vmem:[#allocation7 + $0x28] sm:$0xff]  ;;  %v440_v28 = vld [vmem:[#allocation7 + $0x10] sm:$0xff] }
  0x48   : > { %v441_v29 = vld [vmem:[#allocation7 + $0x18] sm:$0xff]  ;;  %v438_v30 = vld [vmem:[#allocation7] sm:$0xff]  ;;  %v439_v31 = vld [vmem:[#allocation7 + $0x8] sm:$0xff] }
  0x49   : > { %475 = vmatpush.msra.mxu0 %v458_v10  ;;  %516 = vmatpush.msra.mxu1 %v459_v11  ;;  %v430_v32 = vld [vmem:[%s2061_s23] sm:$0xff]  ;;  %v431_v33 = vld [vmem:[%s2061_s23 + $0x8] sm:$0xff]  ;;  %v432_v34 = vld [vmem:[%s2061_s23 + $0x10] sm:$0xff] }
  0x4a   : > { %v433_v35 = vld [vmem:[%s2061_s23 + $0x18] sm:$0xff]  ;;  %v434_v36 = vld [vmem:[%s2061_s23 + $0x20] sm:$0xff]  ;;  %v435_v37 = vld [vmem:[%s2061_s23 + $0x28] sm:$0xff] }
  0x4b   : > { %476 = vmatpush.msra.mxu0 %v456_v12  ;;  %517 = vmatpush.msra.mxu1 %v457_v13  ;;  %v436_v38 = vld [vmem:[%s2061_s23 + $0x30] sm:$0xff]  ;;  %v437_v39 = vld [vmem:[%s2061_s23 + $0x38] sm:$0xff] }
  0x4d   : > { %477 = vmatpush.msra.mxu0 %v454_v14  ;;  %518 = vmatpush.msra.mxu1 %v455_v15 }
  0x4f   : > { %478 = vmatpush.msra.mxu0 %v452_v16  ;;  %519 = vmatpush.msra.mxu1 %v453_v17 }
  0x51   : > { %479 = vmatpush.msra.mxu0 %v450_v18  ;;  %520 = vmatpush.msra.mxu1 %v451_v19 }
  0x53   : > { %480 = vmatpush.msra.mxu0 %v448_v20  ;;  %521 = vmatpush.msra.mxu1 %v449_v21 }
  0x55   : > { %481 = vmatpush.msra.mxu0 %v446_v22  ;;  %522 = vmatpush.msra.mxu1 %v447_v23 }
  0x57   : > { %482 = vmatpush.msra.mxu0 %v444_v24  ;;  %523 = vmatpush.msra.mxu1 %v445_v25 }
  0x59   : > { %483 = vmatpush.msra.mxu0 %v442_v26  ;;  %524 = vmatpush.msra.mxu1 %v443_v27 }
  0x5b   : > { %484 = vmatpush.msra.mxu0 %v440_v28  ;;  %525 = vmatpush.msra.mxu1 %v441_v29 }
  0x5d   : > { %485 = vmatpush.msra.mxu0 %v438_v30  ;;  %526 = vmatpush.msra.mxu1 %v439_v31 }
  0x5e   : > { %486 = vmatmul.f32.vlgmr.msra.gmra.mxu0 %v430_v32  ;;  %527 = vmatmul.f32.vlgmr.msra.gmra.mxu1 %v430_v32 }
  0x66   : > { %489 = vmatmul.f32.gmra.mxu0 %v431_v33  ;;  %530 = vmatmul.f32.gmra.mxu1 %v431_v33 }
  0x6e   : > { %492 = vmatmul.f32.gmra.mxu0 %v432_v34  ;;  %533 = vmatmul.f32.gmra.mxu1 %v432_v34 }
  0x76   : > { %495 = vmatmul.f32.gmra.mxu0 %v433_v35  ;;  %536 = vmatmul.f32.gmra.mxu1 %v433_v35 }
  0x7e   : > { %498 = vmatmul.f32.gmra.mxu0 %v434_v36  ;;  %539 = vmatmul.f32.gmra.mxu1 %v434_v36 }
  0x86   : > { %501 = vmatmul.f32.gmra.mxu0 %v435_v37  ;;  %542 = vmatmul.f32.gmra.mxu1 %v435_v37 }
  0x8e   : > { %504 = vmatmul.f32.gmra.mxu0 %v436_v38  ;;  %545 = vmatmul.f32.gmra.mxu1 %v436_v38 }
  0x96   : > { %507 = vmatmul.f32.gmra.mxu0 %v437_v39  ;;  %548 = vmatmul.f32.gmra.mxu1 %v437_v39 }
  0xdb   : > { %v487_v40 = vpop.f32.mrf.mxu0  ;;  %v528_v41 = vpop.f32.mrf.mxu1 }
  0xdc   : > { %v570_v45 = vmul.f32 %v2083_v44, %v487_v40  ;;  %v571_v46 = vmul.f32 %v2083_v44, %v528_v41  ;;  %vm552_vm0 = vcmp.gt.f32.partialorder %v487_v40, 0.0  ;;  %vm553_vm1 = vcmp.gt.f32.partialorder %v528_v41, 0.0 }
  0xde   : > { %v2088_v50 = vsel %vm552_vm0, %v487_v40, %v570_v45  ;;  %v2090_v51 = vsel %vm553_vm1, %v528_v41, %v571_v46 }
  0xdf   : > { %v604_v53 = vadd.f32 %v2090_v51, %v2088_v50  ;;  %v637_v54 = vmul.f32 %v2088_v50, %v2088_v50  ;;  %v638_v57 = vmul.f32 %v2090_v51, %v2090_v51 }
  0xe1   : > { %v653_v0 = vadd.f32 %v638_v57, %v637_v54 }
  0xe3   : > { %v490_v42 = vpop.f32.mrf.mxu0  ;;  %v531_v43 = vpop.f32.mrf.mxu1 }
  0xe4   : > { %v572_v49 = vmul.f32 %v2083_v44, %v490_v42  ;;  %vm554_vm2 = vcmp.gt.f32.partialorder %v490_v42, 0.0  ;;  %v573_v55 = vmul.f32 %v2083_v44, %v531_v43  ;;  %vm555_vm3 = vcmp.gt.f32.partialorder %v531_v43, 0.0 }
  0xe6   : > { %v2092_v52 = vsel %vm554_vm2, %v490_v42, %v572_v49  ;;  %v2105_v62 = vsel %vm555_vm3, %v531_v43, %v573_v55 }
  0xe7   : > { %v605_v58 = vadd.f32 %v604_v53, %v2092_v52  ;;  %v639_v61 = vmul.f32 %v2092_v52, %v2092_v52  ;;  %v640_v6 = vmul.f32 %v2105_v62, %v2105_v62 }
  0xe9   : > { %v606_v1 = vadd.f32 %v605_v58, %v2105_v62  ;;  %v654_v4 = vadd.f32 %v653_v0, %v639_v61 }
  0xeb   : > { %v493_v47 = vpop.f32.mrf.mxu0  ;;  %v534_v48 = vpop.f32.mrf.mxu1  ;;  %v655_v12 = vadd.f32 %v654_v4, %v640_v6 }
  0xec   : > { %v574_v56 = vmul.f32 %v2083_v44, %v493_v47  ;;  %vm556_vm4 = vcmp.gt.f32.partialorder %v493_v47, 0.0  ;;  %v575_v2 = vmul.f32 %v2083_v44, %v534_v48  ;;  %vm557_vm5 = vcmp.gt.f32.partialorder %v534_v48, 0.0 }
  0xee   : > { %v2107_v63 = vsel %vm556_vm4, %v493_v47, %v574_v56  ;;  %v2117_v10 = vsel %vm557_vm5, %v534_v48, %v575_v2 }
  0xef   : > { %v607_v5 = vadd.f32 %v606_v1, %v2107_v63  ;;  %v641_v7 = vmul.f32 %v2107_v63, %v2107_v63  ;;  %v642_v18 = vmul.f32 %v2117_v10, %v2117_v10 }
  0xf1   : > { %v608_v13 = vadd.f32 %v607_v5, %v2117_v10  ;;  %v656_v16 = vadd.f32 %v655_v12, %v641_v7 }
  0xf3   : > { %v496_v59 = vpop.f32.mrf.mxu0  ;;  %v537_v60 = vpop.f32.mrf.mxu1  ;;  %v657_v22 = vadd.f32 %v656_v16, %v642_v18 }
  0xf4   : > { %v576_v3 = vmul.f32 %v2083_v44, %v496_v59  ;;  %vm558_vm6 = vcmp.gt.f32.partialorder %v496_v59, 0.0  ;;  %v577_v14 = vmul.f32 %v2083_v44, %v537_v60  ;;  %vm559_vm7 = vcmp.gt.f32.partialorder %v537_v60, 0.0 }
  0xf6   : > { %v2119_v11 = vsel %vm558_vm6, %v496_v59, %v576_v3  ;;  %v2129_v20 = vsel %vm559_vm7, %v537_v60, %v577_v14  ;;  %v1876_v14 = vmov 16384.0  }
  0xf7   : > { %v609_v17 = vadd.f32 %v608_v13, %v2119_v11  ;;  %v643_v19 = vmul.f32 %v2119_v11, %v2119_v11  ;;  %v644_v30 = vmul.f32 %v2129_v20, %v2129_v20  ;;  %1659 = vrcp.f32 %v1876_v14  ;;  %v868_v14 = vld [vmem:[#allocation9] ss:$4 sm:$0x3] }
  0xf9   : > { %v610_v23 = vadd.f32 %v609_v17, %v2129_v20  ;;  %v658_v28 = vadd.f32 %v657_v22, %v643_v19 }
  0xfb   : > { %v499_v8 = vpop.f32.mrf.mxu0  ;;  %v540_v9 = vpop.f32.mrf.mxu1  ;;  %v659_v34 = vadd.f32 %v658_v28, %v644_v30 }
  0xfc   : > { %v578_v15 = vmul.f32 %v2083_v44, %v499_v8  ;;  %vm560_vm8 = vcmp.gt.f32.partialorder %v499_v8, 0.0  ;;  %v579_v26 = vmul.f32 %v2083_v44, %v540_v9  ;;  %vm561_vm9 = vcmp.gt.f32.partialorder %v540_v9, 0.0 }
  0xfe   : > { %v2131_v21 = vsel %vm560_vm8, %v499_v8, %v578_v15  ;;  %v2141_v32 = vsel %vm561_vm9, %v540_v9, %v579_v26  ;;  %v1660_v15 = vpop.eup %1659 }
  0xff   : > { %v611_v29 = vadd.f32 %v610_v23, %v2131_v21  ;;  %v645_v31 = vmul.f32 %v2131_v21, %v2131_v21  ;;  %v646_v42 = vmul.f32 %v2141_v32, %v2141_v32  ;;  %v629_v16 = vmul.f32 16384.0, %v1660_v15 }
 0x100   : > { %vm633_vm0 = vweird.f32 %v1660_v15 }
 0x101   : > { %v612_v35 = vadd.f32 %v611_v29, %v2141_v32  ;;  %v660_v37 = vadd.f32 %v659_v34, %v645_v31  ;;  %v630_v17 = vsub.f32 1.0, %v629_v16 }
 0x103   : > { %v502_v24 = vpop.f32.mrf.mxu0  ;;  %v543_v25 = vpop.f32.mrf.mxu1  ;;  %v661_v47 = vadd.f32 %v660_v37, %v646_v42  ;;  %v631_v23 = vmul.f32 %v1660_v15, %v630_v17 }
 0x104   : > { %v580_v27 = vmul.f32 %v2083_v44, %v502_v24  ;;  %vm562_vm10 = vcmp.gt.f32.partialorder %v502_v24, 0.0  ;;  %v581_v36 = vmul.f32 %v2083_v44, %v543_v25  ;;  %vm563_vm11 = vcmp.gt.f32.partialorder %v543_v25, 0.0 }
 0x105   : > { %v632_v26 = vadd.f32 %v1660_v15, %v631_v23 }
 0x106   : > { %v2143_v33 = vsel %vm562_vm10, %v502_v24, %v580_v27  ;;  %v2153_v45 = vsel %vm563_vm11, %v543_v25, %v581_v36 }
 0x107   : > { %v613_v38 = vadd.f32 %v612_v35, %v2143_v33  ;;  %v647_v43 = vmul.f32 %v2143_v33, %v2143_v33  ;;  %v648_v55 = vmul.f32 %v2153_v45, %v2153_v45  ;;  %v634_v34 = vsel %vm633_vm0, %v1660_v15, %v632_v26 }
 0x109   : > { %v614_v48 = vadd.f32 %v613_v38, %v2153_v45  ;;  %v662_v53 = vadd.f32 %v661_v47, %v647_v43 }
 0x10b   : > { %v505_v39 = vpop.f32.mrf.mxu0  ;;  %v546_v40 = vpop.f32.mrf.mxu1  ;;  %v663_v0 = vadd.f32 %v662_v53, %v648_v55  ;;  %v602_v53 = vld [vmem:[%s2645_s3] sm:$0x3] }
 0x10c   : > { %vm564_vm12 = vcmp.gt.f32.partialorder %v505_v39, 0.0  ;;  %v582_v41 = vmul.f32 %v2083_v44, %v505_v39  ;;  %v583_v49 = vmul.f32 %v2083_v44, %v546_v40  ;;  %vm565_vm13 = vcmp.gt.f32.partialorder %v546_v40, 0.0 }
 0x10e   : > { %v2155_v46 = vsel %vm564_vm12, %v505_v39, %v582_v41  ;;  %v2164_v59 = vsel %vm565_vm13, %v546_v40, %v583_v49 }
 0x10f   : > { %v615_v54 = vadd.f32 %v614_v48, %v2155_v46  ;;  %v649_v56 = vmul.f32 %v2155_v46, %v2155_v46  ;;  %v650_v6 = vmul.f32 %v2164_v59, %v2164_v59 }
 0x111   : > { %v616_v1 = vadd.f32 %v615_v54, %v2164_v59  ;;  %v664_v4 = vadd.f32 %v663_v0, %v649_v56  ;;  %v762_v56 = vlaneseq }
 0x113   : > { %v508_v57 = vpop.f32.mrf.mxu0  ;;  %v549_v58 = vpop.f32.mrf.mxu1 }
 0x114   : > { %vm566_vm14 = vcmp.gt.f32.partialorder %v508_v57, 0.0  ;;  %v584_v60 = vmul.f32 %v2083_v44, %v508_v57  ;;  %v585_v61 = vmul.f32 %v2083_v44, %v549_v58  ;;  %vm567_vm15 = vcmp.gt.f32.partialorder %v549_v58, 0.0 }
 0x115   : > { %v665_v44 = vadd.f32 %v664_v4, %v650_v6  ;;  %v2194_v4 = vshrl.u32 %v762_v56, 7 }
 0x116   : > { %v2169_v2 = vsel %vm566_vm14, %v508_v57, %v584_v60  ;;  %v2172_v5 = vsel %vm567_vm15, %v549_v58, %v585_v61 }
 0x117   : > { %v617_v3 = vadd.f32 %v616_v1, %v2169_v2  ;;  %v651_v7 = vmul.f32 %v2169_v2, %v2169_v2  ;;  %v652_v12 = vmul.f32 %v2172_v5, %v2172_v5  ;;  %vm787_vm4 = vcmp.lt.s32.totalorder %v2194_v4, 1 }
 0x118   : > { %vm961_vm6 = vcmp.lt.s32.totalorder %v2194_v4, 7 }
 0x119   : > { %v618_v8 = vadd.f32 %v617_v3, %v2172_v5  ;;  %v666_v9 = vadd.f32 %v665_v44, %v651_v7 }
 0x11b   : > { %619 = vadd.xlane.f32.xlu0 %v618_v8  ;;  %v667_v13 = vadd.f32 %v666_v9, %v652_v12  ;;  %v603_v8 = vld [vmem:[%s2646_s4] sm:$0x3] }
 0x11c   : > { %v743_v15 = vperm.slane %v603_v8, 1 }
 0x123   : > { %668 = vadd.xlane.f32.xlu0 %v667_v13 }
 0x18e   : > { %v620_v18 = vpop.xlane.xlu0 %619 }
 0x18f   : > { %v621_v19 = vrot.slane %v620_v18, 4 }
 0x191   : > { %v622_v22 = vadd.f32 %v621_v19, %v620_v18 }
 0x193   : > { %v623_v24 = vrot.slane %v622_v22, 2 }
 0x195   : > { %v624_v25 = vadd.f32 %v623_v24, %v622_v22 }
 0x196   : > { %v669_v27 = vpop.xlane.xlu0 %668 }
 0x197   : > { %v670_v28 = vrot.slane %v669_v27, 4  ;;  %v625_v29 = vrot.slane %v624_v25, 1 }
 0x199   : > { %v671_v30 = vadd.f32 %v670_v28, %v669_v27  ;;  %v626_v31 = vadd.f32 %v625_v29, %v624_v25 }
 0x19b   : > { %v672_v35 = vrot.slane %v671_v30, 2  ;;  %1561 = vpush %v626_v31 }
 0x19c   : > { %1563 = vpush %v634_v34 }
 0x19d   : > { %v673_v36 = vadd.f32 %v672_v35, %v671_v30 }
 0x19f   : > { %v674_v37 = vrot.slane %v673_v36, 1 }
 0x1a1   : > { %v675_v38 = vadd.f32 %v674_v37, %v673_v36 }
 0x1a3   : > { %1565 = vpush %v675_v38 }
 0x1cc   : > { %s1562_s26 = spop %1561 }
 0x1cd   : > { %s2181_s28 = spop %1563 }
 0x1ce   : > { %s636_s30 = smul.f32 %s2181_s28, %s1562_s26  ;;  %s1813_s26 = scalar_lea.hbm %s2652_s10, 128 }
 0x1d0   : > { %s686_s14 = smul.f32 %s636_s30, %s636_s30  ;;  %v701_v55 = vstv %s636_s30  ;;  %s2332_s30 = sld [smem:[#allocation3]] }
 0x1d1   : > { %v706_v58 = vsub.f32 %v2107_v63, %v701_v55  ;;  %v707_v60 = vsub.f32 %v2117_v10, %v701_v55  ;;  %v702_v61 = vsub.f32 %v2088_v50, %v701_v55  ;;  %v703_v0 = vsub.f32 %v2090_v51, %v701_v55 }
 0x1d2   : > { %v704_v1 = vsub.f32 %v2092_v52, %v701_v55  ;;  %v705_v3 = vsub.f32 %v2105_v62, %v701_v55  ;;  %v708_v63 = vsub.f32 %v2119_v11, %v701_v55  ;;  %v709_v10 = vsub.f32 %v2129_v20, %v701_v55 }
 0x1d3   : > { %v710_v50 = vsub.f32 %v2131_v21, %v701_v55  ;;  %v711_v51 = vsub.f32 %v2141_v32, %v701_v55  ;;  %v712_v52 = vsub.f32 %v2143_v33, %v701_v55  ;;  %v713_v62 = vsub.f32 %v2153_v45, %v701_v55 }
 0x1d4   : > { %s1566_s25 = spop %1565  ;;  %v714_v44 = vsub.f32 %v2155_v46, %v701_v55  ;;  %v715_v9 = vsub.f32 %v2164_v59, %v701_v55  ;;  %v716_v12 = vsub.f32 %v2169_v2, %v701_v55  ;;  %v717_v13 = vsub.f32 %v2172_v5, %v701_v55 }
 0x1d5   : > { %s685_s6 = smul.f32 %s1566_s25, %s2181_s28  ;;  %v742_v11 = vperm.slane %v603_v8, 0  ;;  %v2210_v20 = vadd.s32 56, %v2194_v4  ;;  %v2213_v21 = vadd.s32 4294967295, %v2194_v4  ;;  %v2216_v2 = vperm.slane %v868_v14, 0 }
 0x1d6   : > { %v871_v8 = vperm.slane %v868_v14, 1 }
 0x1d7   : > { %s687_s24 = ssub.f32 %s685_s6, %s686_s14  ;;  %vm812_vm5 = vcmp.ge.s32.totalorder %v2213_v21, 0 }
 0x1d9   : > { %s688_s27 = sadd.f32 1e-08, %s687_s24 }
 0x1db   : > { %v689_v39 = vstv %s688_s27 }
 0x1dc   : > { %1661 = vrsqrt.f32 %v689_v39  ;;  %vm696_vm2 = vweird.f32 %v689_v39 }
 0x1e2   : > { %v1662_v40 = vpop.eup %1661 }
 0x1e3   : > { %v691_v41 = vmul.f32 %v1662_v40, %v689_v39  ;;  %vm697_vm1 = vweird.f32 %v1662_v40 }
 0x1e4   : > { %vm698_vm3 = vmor %vm696_vm2, %vm697_vm1 }
 0x1e5   : > { %v692_v42 = vmul.f32 %v1662_v40, %v691_v41 }
 0x1e7   : > { %v693_v43 = vmul.f32 0.5, %v692_v42 }
 0x1e9   : > { %v694_v47 = vsub.f32 1.5, %v693_v43 }
 0x1eb   : > { %v695_v48 = vmul.f32 %v1662_v40, %v694_v47 }
 0x1ed   : > { %v699_v49 = vsel %vm698_vm3, %v1662_v40, %v695_v48 }
 0x1ee   : > { %1567 = vpush %v699_v49 }
 0x21f   : > { %s1568_s29 = spop %1567 }
 0x220   : > { %v718_v54 = vstv %s1568_s29 }
 0x221   : > { %v719_v57 = vmul.f32 %v718_v54, %v602_v53 }
 0x223   : > { %v721_v6 = vperm.slane %v719_v57, 0  ;;  %v722_v7 = vperm.slane %v719_v57, 1 }
 0x225   : > { %v725_v32 = vmul.f32 %v721_v6, %v702_v61  ;;  %v726_v33 = vmul.f32 %v722_v7, %v703_v0  ;;  %v739_v45 = vmul.f32 %v721_v6, %v716_v12  ;;  %v740_v16 = vmul.f32 %v722_v7, %v717_v13 }
 0x226   : > { %v727_v46 = vmul.f32 %v721_v6, %v704_v1  ;;  %v733_v17 = vmul.f32 %v721_v6, %v710_v50  ;;  %v735_v59 = vmul.f32 %v721_v6, %v712_v52  ;;  %v731_v5 = vmul.f32 %v721_v6, %v708_v63 }
 0x227   : > { %v732_v18 = vmul.f32 %v722_v7, %v709_v10  ;;  %v734_v19 = vmul.f32 %v722_v7, %v711_v51  ;;  %v736_v22 = vmul.f32 %v722_v7, %v713_v62  ;;  %v729_v23 = vmul.f32 %v721_v6, %v706_v58 }
 0x228   : > { %v730_v24 = vmul.f32 %v722_v7, %v707_v60  ;;  %v728_v25 = vmul.f32 %v722_v7, %v705_v3  ;;  %v737_v26 = vmul.f32 %v721_v6, %v714_v44  ;;  %v2218_v27 = vadd.f32 %v742_v11, %v725_v32  ;;  %v907_v60 = vld [vmem:[#allocation9 + $0x1] ss:$4 sm:$0x3] }
 0x229   : > { %v2220_v28 = vadd.f32 %v743_v15, %v726_v33  ;;  %v2222_v29 = vadd.f32 %v742_v11, %v739_v45  ;;  %v2224_v30 = vadd.f32 %v743_v15, %v740_v16  ;;  %v738_v31 = vmul.f32 %v722_v7, %v715_v9 }
 0x22a   : > { %v2226_v34 = vadd.f32 %v742_v11, %v727_v46  ;;  %v2228_v35 = vadd.f32 %v742_v11, %v733_v17  ;;  %v2230_v36 = vadd.f32 %v742_v11, %v735_v59  ;;  %v2232_v37 = vadd.f32 %v742_v11, %v731_v5 }
 0x22b   : > { %v2234_v38 = vadd.f32 %v743_v15, %v732_v18  ;;  %v2236_v39 = vadd.f32 %v743_v15, %v734_v19  ;;  %v2238_v40 = vadd.f32 %v743_v15, %v736_v22  ;;  %v2240_v41 = vadd.f32 %v743_v15, %v728_v25 }
 0x22c   : > { %v2242_v42 = vadd.f32 %v742_v11, %v729_v23  ;;  %v2244_v43 = vadd.f32 %v743_v15, %v730_v24  ;;  %v2246_v47 = vadd.f32 %v742_v11, %v737_v26  ;;  %v771_v48 = vrot.slane %v2218_v27, 7 }
 0x22d   : > { %v772_v49 = vrot.slane %v2220_v28, 7  ;;  %v785_v53 = vrot.slane %v2222_v29, 7  ;;  %v786_v54 = vrot.slane %v2224_v30, 7  ;;  %v2252_v55 = vadd.f32 %v743_v15, %v738_v31 }
 0x22e   : > { %v773_v56 = vrot.slane %v2226_v34, 7  ;;  %v779_v57 = vrot.slane %v2228_v35, 7  ;;  %v781_v58 = vrot.slane %v2230_v36, 7  ;;  %v777_v61 = vrot.slane %v2232_v37, 7 }
 0x22f   : > { %v778_v0 = vrot.slane %v2234_v38, 7  ;;  %v780_v1 = vrot.slane %v2236_v39, 7  ;;  %v782_v3 = vrot.slane %v2238_v40, 7  ;;  %v774_v6 = vrot.slane %v2240_v41, 7 }
 0x230   : > { %v775_v7 = vrot.slane %v2242_v42, 7  ;;  %v776_v63 = vrot.slane %v2244_v43, 7  ;;  %v783_v10 = vrot.slane %v2246_v47, 7  ;;  %v802_v50 = vsel %vm787_vm4, %v785_v53, %v771_v48 }
 0x231   : > { %v803_v51 = vsel %vm787_vm4, %v786_v54, %v772_v49  ;;  %v784_v52 = vrot.slane %v2252_v55, 7  ;;  %v792_v62 = vsel %vm787_vm4, %v779_v57, %v781_v58  ;;  %v909_v44 = vperm.slane %v907_v60, 0 }
 0x232   : > { %v910_v9 = vperm.slane %v907_v60, 1  ;;  %v793_v12 = vsel %vm787_vm4, %v780_v1, %v782_v3  ;;  %v794_v13 = vsel %vm787_vm4, %v777_v61, %v779_v57  ;;  %v795_v14 = vsel %vm787_vm4, %v778_v0, %v780_v1 }
 0x233   : > { %v800_v11 = vsel %vm787_vm4, %v771_v48, %v773_v56  ;;  %v798_v15 = vsel %vm787_vm4, %v773_v56, %v775_v7  ;;  %v801_v32 = vsel %vm787_vm4, %v772_v49, %v774_v6  ;;  %v852_v33 = vsel %vm812_vm5, %v802_v50, 0.0 }
 0x234   : > { %v853_v45 = vsel %vm812_vm5, %v803_v51, 0.0  ;;  %v788_v16 = vsel %vm787_vm4, %v783_v10, %v785_v53  ;;  %v796_v46 = vsel %vm787_vm4, %v775_v7, %v777_v61  ;;  %v797_v17 = vsel %vm787_vm4, %v776_v63, %v778_v0 }
 0x235   : > { %v799_v59 = vsel %vm787_vm4, %v774_v6, %v776_v63  ;;  %v789_v5 = vsel %vm787_vm4, %v784_v52, %v786_v54  ;;  %v790_v18 = vsel %vm787_vm4, %v781_v58, %v783_v10  ;;  %v791_v21 = vsel %vm787_vm4, %v782_v3, %v784_v52 }
 0x236   : > { %v876_v19 = vmul.f32 %v2216_v2, %v800_v11  ;;  %v874_v22 = vmul.f32 %v2216_v2, %v852_v33  ;;  %v875_v23 = vmul.f32 %v871_v8, %v853_v45  ;;  %v877_v24 = vmul.f32 %v871_v8, %v801_v32 }
 0x237   : > { %v878_v25 = vmul.f32 %v2216_v2, %v798_v15  ;;  %v879_v26 = vmul.f32 %v871_v8, %v799_v59  ;;  %v880_v31 = vmul.f32 %v2216_v2, %v796_v46  ;;  %v881_v48 = vmul.f32 %v871_v8, %v797_v17 }
 0x238   : > { %v882_v49 = vmul.f32 %v2216_v2, %v794_v13  ;;  %v883_v53 = vmul.f32 %v871_v8, %v795_v14  ;;  %v884_v54 = vmul.f32 %v2216_v2, %v792_v62  ;;  %v885_v56 = vmul.f32 %v871_v8, %v793_v12  ;;  %v1043_v12 = vld [vmem:[#allocation9 + $0x2] ss:$4 sm:$0x3] }
 0x239   : > { %v886_v57 = vmul.f32 %v2216_v2, %v790_v18  ;;  %v887_v58 = vmul.f32 %v871_v8, %v791_v21  ;;  %v888_v60 = vmul.f32 %v2216_v2, %v788_v16  ;;  %v889_v61 = vmul.f32 %v871_v8, %v789_v5 }
 0x23a   : > { %v913_v0 = vmul.f32 %v909_v44, %v2218_v27  ;;  %v914_v1 = vmul.f32 %v910_v9, %v2220_v28  ;;  %v915_v3 = vmul.f32 %v909_v44, %v2226_v34  ;;  %v916_v6 = vmul.f32 %v910_v9, %v2240_v41 }
 0x23b   : > { %v917_v7 = vmul.f32 %v909_v44, %v2242_v42  ;;  %v918_v63 = vmul.f32 %v910_v9, %v2244_v43  ;;  %v919_v10 = vmul.f32 %v909_v44, %v2232_v37  ;;  %v920_v50 = vmul.f32 %v910_v9, %v2234_v38 }
 0x23c   : > { %v921_v51 = vmul.f32 %v909_v44, %v2228_v35  ;;  %v922_v2 = vmul.f32 %v910_v9, %v2236_v39  ;;  %v923_v8 = vmul.f32 %v909_v44, %v2230_v36  ;;  %v924_v52 = vmul.f32 %v910_v9, %v2238_v40 }
 0x23d   : > { %v925_v62 = vmul.f32 %v909_v44, %v2246_v47  ;;  %v945_v13 = vrot.slane %v2218_v27, 1  ;;  %v946_v14 = vrot.slane %v2220_v28, 1  ;;  %v947_v11 = vrot.slane %v2226_v34, 1 }
 0x23e   : > { %v948_v15 = vrot.slane %v2240_v41, 1  ;;  %v926_v32 = vmul.f32 %v910_v9, %v2252_v55  ;;  %v927_v33 = vmul.f32 %v909_v44, %v2222_v29  ;;  %v928_v45 = vmul.f32 %v910_v9, %v2224_v30 }
 0x23f   : > { %v929_v16 = vadd.f32 %v913_v0, %v874_v22  ;;  %v930_v46 = vadd.f32 %v914_v1, %v875_v23  ;;  %v931_v17 = vadd.f32 %v915_v3, %v876_v19  ;;  %v932_v59 = vadd.f32 %v916_v6, %v877_v24 }
 0x240   : > { %v933_v5 = vadd.f32 %v917_v7, %v878_v25  ;;  %v2334_v18 = vadd.f32 %v918_v63, %v879_v26  ;;  %v2336_v34 = vperm.slane %v1043_v12, 0  ;;  %v2338_v41 = vperm.slane %v1043_v12, 1 }
 0x241   : > { %v2340_v21 = vadd.f32 %v919_v10, %v880_v31  ;;  %v949_v44 = vrot.slane %v2242_v42, 1  ;;  %v974_v9 = vsel %vm961_vm6, %v945_v13, %v947_v11  ;;  %v975_v19 = vsel %vm961_vm6, %v946_v14, %v948_v15 }
 0x242   : > { %v2351_v22 = vadd.f32 %v920_v50, %v881_v48  ;;  %v2353_v23 = vadd.f32 %v921_v51, %v882_v49  ;;  %v2355_v24 = vadd.f32 %v922_v2, %v883_v53  ;;  %v2357_v25 = vadd.f32 %v923_v8, %v884_v54 }
 0x243   : > { %v2359_v26 = vadd.f32 %v924_v52, %v885_v56  ;;  %v2361_v42 = vadd.f32 %v925_v62, %v886_v57  ;;  %v2363_v31 = vadd.f32 %v926_v32, %v887_v58  ;;  %v950_v0 = vrot.slane %v2244_v43, 1 }
 0x244   : > { %v2366_v1 = vadd.f32 %v927_v33, %v888_v60  ;;  %v951_v48 = vrot.slane %v2232_v37, 1  ;;  %v1049_v49 = vmul.f32 %v2336_v34, %v974_v9  ;;  %v1050_v53 = vmul.f32 %v2338_v41, %v975_v19 }
 0x245   : > { %v952_v54 = vrot.slane %v2234_v38, 1  ;;  %v955_v56 = vrot.slane %v2230_v36, 1  ;;  %v957_v57 = vrot.slane %v2246_v47, 1  ;;  %v972_v58 = vsel %vm961_vm6, %v947_v11, %v949_v44 }
 0x246   : > { %v2376_v3 = vadd.f32 %v928_v45, %v889_v61  ;;  %v953_v43 = vrot.slane %v2228_v35, 1  ;;  %v1065_v60 = vadd.f32 %v1049_v49, %v929_v16  ;;  %v1066_v6 = vadd.f32 %v1050_v53, %v930_v46 }
 0x247   : > { %v956_v37 = vrot.slane %v2238_v40, 1  ;;  %v958_v7 = vrot.slane %v2252_v55, 1  ;;  %v973_v38 = vsel %vm961_vm6, %v948_v15, %v950_v0  ;;  %v2384_v63 = vstv %s2332_s30 }
 0x248   : > { %v954_v36 = vrot.slane %v2236_v39, 1  ;;  %v959_v47 = vrot.slane %v2222_v29, 1  ;;  %v960_v61 = vrot.slane %v2224_v30, 1  ;;  %v1051_v10 = vmul.f32 %v2336_v34, %v972_v58 }
 0x249   : > { %v964_v35 = vsel %vm961_vm6, %v955_v56, %v957_v57  ;;  %v970_v40 = vsel %vm961_vm6, %v949_v44, %v951_v48  ;;  %v971_v55 = vsel %vm961_vm6, %v950_v0, %v952_v54  ;;  %v985_v50 = vadd.s32 1, %v2210_v20 }
 0x24a   : > { %v1052_v51 = vmul.f32 %v2338_v41, %v973_v38  ;;  %v1067_v39 = vadd.f32 %v1051_v10, %v931_v17  ;;  %v1099_v29 = vmul.f32 %v2384_v63, %v1065_v60  ;;  %v1100_v30 = vmul.f32 %v2384_v63, %v1066_v6 }
 0x24b   : > { %v965_v2 = vsel %vm961_vm6, %v956_v37, %v958_v7  ;;  %v966_v8 = vsel %vm961_vm6, %v953_v43, %v955_v56  ;;  %vm1081_vm7 = vcmp.gt.f32.partialorder %v1065_v60, 0.0  ;;  %vm1082_vm8 = vcmp.gt.f32.partialorder %v1066_v6, 0.0 }
 0x24c   : > { %v962_v52 = vsel %vm961_vm6, %v957_v57, %v959_v47  ;;  %v967_v20 = vsel %vm961_vm6, %v954_v36, %v956_v37  ;;  %v1053_v62 = vmul.f32 %v2336_v34, %v970_v40  ;;  %v1068_v12 = vadd.f32 %v1052_v51, %v932_v59 }
 0x24d   : > { %v968_v11 = vsel %vm961_vm6, %v951_v48, %v953_v43  ;;  %v976_v15 = vsel %vm961_vm6, %v959_v47, %v945_v13  ;;  %vm1001_vm9 = vcmp.lt.s32.totalorder %v985_v50, 64  ;;  %v1054_v32 = vmul.f32 %v2338_v41, %v971_v55 }
 0x24e   : > { %v1069_v33 = vadd.f32 %v1053_v62, %v933_v5  ;;  %v1101_v45 = vmul.f32 %v2384_v63, %v1067_v39  ;;  %v2417_v16 = vsel %vm1081_vm7, %v1065_v60, %v1099_v29  ;;  %v2419_v46 = vsel %vm1082_vm8, %v1066_v6, %v1100_v30 }
 0x24f   : > { %v963_v17 = vsel %vm961_vm6, %v958_v7, %v960_v61  ;;  %v969_v59 = vsel %vm961_vm6, %v952_v54, %v954_v36  ;;  %v977_v27 = vsel %vm961_vm6, %v960_v61, %v946_v14  ;;  %vm1083_vm10 = vcmp.gt.f32.partialorder %v1067_v39, 0.0 }
 0x250   : > { %v1040_v13 = vsel %vm1001_vm9, %v976_v15, 0.0  ;;  %v1055_v5 = vmul.f32 %v2336_v34, %v968_v11  ;;  %v1070_v44 = vadd.f32 %v1054_v32, %v2334_v18  ;;  %v1102_v9 = vmul.f32 %v2384_v63, %v1068_v12 }
 0x251   : > { %vm1084_vm11 = vcmp.gt.f32.partialorder %v1068_v12, 0.0  ;;  %v1133_v19 = vadd.f32 %v2419_v46, %v2417_v16  ;;  %v1167_v0 = vmul.f32 %v2419_v46, %v2419_v46  ;;  %v1166_v4 = vmul.f32 %v2417_v16, %v2417_v16 }
 0x252   : > { %v1056_v28 = vmul.f32 %v2338_v41, %v969_v59  ;;  %v1071_v14 = vadd.f32 %v1055_v5, %v2340_v21  ;;  %v1103_v48 = vmul.f32 %v2384_v63, %v1069_v33  ;;  %v2442_v49 = vsel %vm1083_vm10, %v1067_v39, %v1101_v45 }
 0x253   : > { %v1041_v18 = vsel %vm1001_vm9, %v977_v27, 0.0  ;;  %v1057_v53 = vmul.f32 %v2336_v34, %v966_v8  ;;  %vm1085_vm12 = vcmp.gt.f32.partialorder %v1069_v33, 0.0  ;;  %v1134_v54 = vadd.f32 %v1133_v19, %v2442_v49 }
 0x254   : > { %v1058_v56 = vmul.f32 %v2338_v41, %v967_v20  ;;  %v1072_v57 = vadd.f32 %v1056_v28, %v2351_v22  ;;  %v1104_v58 = vmul.f32 %v2384_v63, %v1070_v44  ;;  %v2450_v43 = vsel %vm1084_vm11, %v1068_v12, %v1102_v9 }
 0x255   : > { %vm1086_vm13 = vcmp.gt.f32.partialorder %v1070_v44, 0.0  ;;  %v1135_v21 = vadd.f32 %v1134_v54, %v2450_v43  ;;  %v1168_v60 = vmul.f32 %v2442_v49, %v2442_v49  ;;  %v1182_v6 = vadd.f32 %v1167_v0, %v1166_v4 }
 0x256   : > { %v1059_v37 = vmul.f32 %v2336_v34, %v964_v35  ;;  %v1073_v7 = vadd.f32 %v1057_v53, %v2353_v23  ;;  %v1105_v38 = vmul.f32 %v2384_v63, %v1071_v14  ;;  %v2458_v36 = vsel %vm1085_vm12, %v1069_v33, %v1103_v48 }
 0x257   : > { %vm1087_vm14 = vcmp.gt.f32.partialorder %v1071_v14, 0.0  ;;  %v1136_v22 = vadd.f32 %v1135_v21, %v2458_v36  ;;  %v1169_v47 = vmul.f32 %v2450_v43, %v2450_v43  ;;  %v1183_v61 = vadd.f32 %v1182_v6, %v1168_v60 }
 0x258   : > { %v1060_v10 = vmul.f32 %v2338_v41, %v965_v2  ;;  %v1074_v40 = vadd.f32 %v1058_v56, %v2355_v24  ;;  %v1106_v55 = vmul.f32 %v2384_v63, %v1072_v57  ;;  %v2466_v35 = vsel %vm1086_vm13, %v1070_v44, %v1104_v58 }
 0x259   : > { %vm1088_vm15 = vcmp.gt.f32.partialorder %v1072_v57, 0.0  ;;  %v1137_v23 = vadd.f32 %v1136_v22, %v2466_v35  ;;  %v1170_v50 = vmul.f32 %v2458_v36, %v2458_v36  ;;  %v1184_v51 = vadd.f32 %v1183_v61, %v1169_v47 }
 0x25a   : > { %v1061_v39 = vmul.f32 %v2336_v34, %v962_v52  ;;  %v1075_v29 = vadd.f32 %v1059_v37, %v2357_v25  ;;  %v1107_v30 = vmul.f32 %v2384_v63, %v1073_v7  ;;  %v2474_v2 = vsel %vm1087_vm14, %v1071_v14, %v1105_v38 }
 0x25b   : > { %vm1089_vm0 = vcmp.gt.f32.partialorder %v1073_v7, 0.0  ;;  %v1138_v24 = vadd.f32 %v1137_v23, %v2474_v2  ;;  %v1171_v8 = vmul.f32 %v2466_v35, %v2466_v35  ;;  %v1185_v20 = vadd.f32 %v1184_v51, %v1170_v50 }
 0x25c   : > { %v1062_v62 = vmul.f32 %v2338_v41, %v963_v17  ;;  %v1076_v12 = vadd.f32 %v1060_v10, %v2359_v26  ;;  %v1108_v11 = vmul.f32 %v2384_v63, %v1074_v40  ;;  %v2482_v52 = vsel %vm1088_vm15, %v1072_v57, %v1106_v55 }
 0x25d   : > { %vm1090_vm1 = vcmp.gt.f32.partialorder %v1074_v40, 0.0  ;;  %v1139_v25 = vadd.f32 %v1138_v24, %v2482_v52  ;;  %v1172_v15 = vmul.f32 %v2474_v2, %v2474_v2  ;;  %v1186_v32 = vadd.f32 %v1185_v20, %v1171_v8 }
 0x25e   : > { %v1063_v33 = vmul.f32 %v2336_v34, %v1040_v13  ;;  %v1077_v45 = vadd.f32 %v1061_v39, %v2361_v42  ;;  %v1109_v59 = vmul.f32 %v2384_v63, %v1075_v29  ;;  %v2490_v17 = vsel %vm1089_vm0, %v1073_v7, %v1107_v30 }
 0x25f   : > { %vm1091_vm2 = vcmp.gt.f32.partialorder %v1075_v29, 0.0  ;;  %v1140_v26 = vadd.f32 %v1139_v25, %v2490_v17  ;;  %v1173_v27 = vmul.f32 %v2482_v52, %v2482_v52  ;;  %v1187_v5 = vadd.f32 %v1186_v32, %v1172_v15 }
 0x260   : > { %v1064_v44 = vmul.f32 %v2338_v41, %v1041_v18  ;;  %v1078_v9 = vadd.f32 %v1062_v62, %v2363_v31  ;;  %v1110_v19 = vmul.f32 %v2384_v63, %v1076_v12  ;;  %v2498_v34 = vsel %vm1090_vm1, %v1074_v40, %v1108_v11 }
 0x261   : > { %vm1092_vm3 = vcmp.gt.f32.partialorder %v1076_v12, 0.0  ;;  %v1141_v42 = vadd.f32 %v1140_v26, %v2498_v34  ;;  %v1174_v13 = vmul.f32 %v2490_v17, %v2490_v17  ;;  %v1188_v0 = vadd.f32 %v1187_v5, %v1173_v27  ;;  %v1306_v5 = vld [vmem:[#allocation10 + $0x78] sm:$0xff] }
 0x262   : > { %v1079_v4 = vadd.f32 %v1063_v33, %v2366_v1  ;;  %v1111_v28 = vmul.f32 %v2384_v63, %v1077_v45  ;;  %v2505_v14 = vsel %vm1091_vm2, %v1075_v29, %v1109_v59  ;;  %vm1093_vm4 = vcmp.gt.f32.partialorder %v1077_v45, 0.0  ;;  %1323 = vmatpush.msra.mxu2 %v1306_v5 }
 0x263   : > { %v1142_v41 = vadd.f32 %v1141_v42, %v2505_v14  ;;  %v1175_v31 = vmul.f32 %v2498_v34, %v2498_v34  ;;  %v1189_v48 = vadd.f32 %v1188_v0, %v1174_v13  ;;  %v1080_v18 = vadd.f32 %v1064_v44, %v2376_v3  ;;  %v1322_v44 = vld [vmem:[#allocation10 + $0xf8] sm:$0xff]  ;;  %v1304_v42 = vld [vmem:[#allocation10 + $0x68] sm:$0xff]  ;;  %v1303_v0 = vld [vmem:[#allocation10 + $0x60] sm:$0xff] }
 0x264   : > { %v1112_v53 = vmul.f32 %v2384_v63, %v1078_v9  ;;  %v2512_v54 = vsel %vm1092_vm3, %v1076_v12, %v1110_v19  ;;  %vm1094_vm5 = vcmp.gt.f32.partialorder %v1078_v9, 0.0  ;;  %v1176_v56 = vmul.f32 %v2505_v14, %v2505_v14  ;;  %1364 = vmatpush.msra.mxu3 %v1322_v44  ;;  %v1321_v19 = vld [vmem:[#allocation10 + $0xf0] sm:$0xff]  ;;  %v1320_v13 = vld [vmem:[#allocation10 + $0xe8] sm:$0xff] }
 0x265   : > { %v1143_v1 = vadd.f32 %v1142_v41, %v2512_v54  ;;  %v1190_v57 = vadd.f32 %v1189_v48, %v1175_v31  ;;  %v1113_v58 = vmul.f32 %v2384_v63, %v1079_v4  ;;  %v2518_v21 = vsel %vm1093_vm4, %v1077_v45, %v1111_v28  ;;  %v1302_v28 = vld [vmem:[#allocation10 + $0x58] sm:$0xff]  ;;  %v1301_v31 = vld [vmem:[#allocation10 + $0x50] sm:$0xff] }
 0x266   : > { %vm1095_vm6 = vcmp.gt.f32.partialorder %v1079_v4, 0.0  ;;  %v1177_v3 = vmul.f32 %v2512_v54, %v2512_v54  ;;  %v1114_v37 = vmul.f32 %v2384_v63, %v1080_v18  ;;  %v2524_v7 = vsel %vm1094_vm5, %v1078_v9, %v1112_v53  ;;  %v1305_v9 = vld [vmem:[#allocation10 + $0x70] sm:$0xff]  ;;  %1365 = vmatpush.msra.mxu3 %v1321_v19  ;;  %v1318_v41 = vld [vmem:[#allocation10 + $0xd8] sm:$0xff]  ;;  %v1316_v53 = vld [vmem:[#allocation10 + $0xc8] sm:$0xff] }
 0x267   : > { %v1144_v60 = vadd.f32 %v1143_v1, %v2518_v21  ;;  %v1191_v6 = vadd.f32 %v1190_v57, %v1176_v56  ;;  %vm1096_vm7 = vcmp.gt.f32.partialorder %v1080_v18, 0.0  ;;  %v1178_v22 = vmul.f32 %v2518_v21, %v2518_v21  ;;  %1324 = vmatpush.msra.mxu2 %v1305_v9  ;;  %v1317_v48 = vld [vmem:[#allocation10 + $0xd0] sm:$0xff]  ;;  %v1299_v1 = vld [vmem:[#allocation10 + $0x40] sm:$0xff] }
 0x268   : > { %v2529_v61 = vsel %vm1095_vm6, %v1079_v4, %v1113_v58  ;;  %v1179_v40 = vmul.f32 %v2524_v7, %v2524_v7  ;;  %v2534_v23 = vsel %vm1096_vm7, %v1080_v18, %v1114_v37  ;;  %v1319_v4 = vld [vmem:[#allocation10 + $0xe0] sm:$0xff]  ;;  %1366 = vmatpush.msra.mxu3 %v1320_v13  ;;  %v1300_v18 = vld [vmem:[#allocation10 + $0x48] sm:$0xff]  ;;  %v1298_v58 = vld [vmem:[#allocation10 + $0x38] sm:$0xff] }
 0x269   : > { %v1145_v38 = vadd.f32 %v1144_v60, %v2524_v7  ;;  %v1192_v47 = vadd.f32 %v1191_v6, %v1177_v3  ;;  %v1180_v51 = vmul.f32 %v2529_v61, %v2529_v61  ;;  %v1181_v29 = vmul.f32 %v2534_v23, %v2534_v23  ;;  %1325 = vmatpush.msra.mxu2 %v1304_v42  ;;  %v1315_v56 = vld [vmem:[#allocation10 + $0xc0] sm:$0xff]  ;;  %v1314_v60 = vld [vmem:[#allocation10 + $0xb8] sm:$0xff]  ;;  %v1297_v3 = vld [vmem:[#allocation10 + $0x30] sm:$0xff] }
 0x26a   : > { %1367 = vmatpush.msra.mxu3 %v1319_v4  ;;  %v1313_v6 = vld [vmem:[#allocation10 + $0xb0] sm:$0xff]  ;;  %v1296_v37 = vld [vmem:[#allocation10 + $0x28] sm:$0xff] }
 0x26b   : > { %v1146_v10 = vadd.f32 %v1145_v38, %v2529_v61  ;;  %v1193_v55 = vadd.f32 %v1192_v47, %v1178_v22  ;;  %1326 = vmatpush.msra.mxu2 %v1303_v0  ;;  %v1312_v38 = vld [vmem:[#allocation10 + $0xa8] sm:$0xff] }
 0x26c   : > { %1368 = vmatpush.msra.mxu3 %v1318_v41 }
 0x26d   : > { %v1147_v63 = vadd.f32 %v1146_v10, %v2534_v23  ;;  %v1194_v50 = vadd.f32 %v1193_v55, %v1179_v40  ;;  %1327 = vmatpush.msra.mxu2 %v1302_v28 }
 0x26e   : > { %1369 = vmatpush.msra.mxu3 %v1317_v48 }
 0x26f   : > { %1148 = vadd.xlane.f32.xlu1 %v1147_v63  ;;  %v1195_v39 = vadd.f32 %v1194_v50, %v1180_v51  ;;  %1328 = vmatpush.msra.mxu2 %v1301_v31  ;;  %v1295_v51 = vld [vmem:[#allocation10 + $0x20] sm:$0xff] }
 0x270   : > { %1370 = vmatpush.msra.mxu3 %v1316_v53 }
 0x271   : > { %v1196_v30 = vadd.f32 %v1195_v39, %v1181_v29  ;;  %1329 = vmatpush.msra.mxu2 %v1300_v18  ;;  %v1311_v39 = vld [vmem:[#allocation10 + $0xa0] sm:$0xff]  ;;  %v1294_v29 = vld [vmem:[#allocation10 + $0x18] sm:$0xff] }
 0x272   : > { %1371 = vmatpush.msra.mxu3 %v1315_v56 }
 0x273   : > { %1330 = vmatpush.msra.mxu2 %v1299_v1 }
 0x274   : > { %1372 = vmatpush.msra.mxu3 %v1314_v60 }
 0x275   : > { %1331 = vmatpush.msra.mxu2 %v1298_v58 }
 0x276   : > { %1373 = vmatpush.msra.mxu3 %v1313_v6 }
 0x277   : > { %1197 = vadd.xlane.f32.xlu1 %v1196_v30  ;;  %1332 = vmatpush.msra.mxu2 %v1297_v3  ;;  %v1310_v30 = vld [vmem:[#allocation10 + $0x98] sm:$0xff] }
 0x278   : > { %1374 = vmatpush.msra.mxu3 %v1312_v38 }
 0x279   : > { %1333 = vmatpush.msra.mxu2 %v1296_v37 }
 0x27a   : > { %1375 = vmatpush.msra.mxu3 %v1311_v39 }
 0x27b   : > { %1334 = vmatpush.msra.mxu2 %v1295_v51 }
 0x27c   : > { %1376 = vmatpush.msra.mxu3 %v1310_v30 }
 0x27d   : > { %1335 = vmatpush.msra.mxu2 %v1294_v29 }
 0x2e2   : > { %v1149_v24 = vpop.xlane.xlu1 %1148 }
 0x2e3   : > { %v1150_v8 = vrot.slane %v1149_v24, 4 }
 0x2e5   : > { %v1151_v20 = vadd.f32 %v1150_v8, %v1149_v24  ;;  %v1293_v24 = vld [vmem:[#allocation10 + $0x10] sm:$0xff] }
 0x2e6   : > { %v1309_v8 = vld [vmem:[#allocation10 + $0x90] sm:$0xff]  ;;  %1336 = vmatpush.msra.mxu2 %v1293_v24 }
 0x2e7   : > { %v1152_v62 = vrot.slane %v1151_v20, 2  ;;  %1377 = vmatpush.msra.mxu3 %v1309_v8 }
 0x2e9   : > { %v1153_v12 = vadd.f32 %v1152_v62, %v1151_v20  ;;  %v1292_v20 = vld [vmem:[#allocation10 + $0x8] sm:$0xff] }
 0x2ea   : > { %v1198_v11 = vpop.xlane.xlu1 %1197  ;;  %v1308_v62 = vld [vmem:[#allocation10 + $0x88] sm:$0xff]  ;;  %1337 = vmatpush.msra.mxu2 %v1292_v20 }
 0x2eb   : > { %v1199_v25 = vrot.slane %v1198_v11, 4  ;;  %v1154_v15 = vrot.slane %v1153_v12, 1  ;;  %1378 = vmatpush.msra.mxu3 %v1308_v62 }
 0x2ed   : > { %v1200_v32 = vadd.f32 %v1199_v25, %v1198_v11  ;;  %v1155_v33 = vadd.f32 %v1154_v15, %v1153_v12  ;;  %v1291_v12 = vld [vmem:[#allocation10] sm:$0xff]  ;;  %v1131_v25 = vld [vmem:[%s2649_s7] sm:$0x3] }
 0x2ee   : > { %v1307_v11 = vld [vmem:[#allocation10 + $0x80] sm:$0xff]  ;;  %1338 = vmatpush.msra.mxu2 %v1291_v12  ;;  %v1665_v12 = vld [vmem:[%s2061_s23] sm:$0xff] }
 0x2ef   : > { %v1201_v45 = vrot.slane %v1200_v32, 2  ;;  %1569 = vpush %v1155_v33  ;;  %1379 = vmatpush.msra.mxu3 %v1307_v11  ;;  %v1132_v33 = vld [vmem:[%s2650_s8] sm:$0x3] }
 0x2f0   : > { %v1271_v44 = vperm.slane %v1132_v33, 0  ;;  %v1272_v9 = vperm.slane %v1132_v33, 1 }
 0x2f1   : > { %v1202_v59 = vadd.f32 %v1201_v45, %v1200_v32 }
 0x2f3   : > { %v1203_v26 = vrot.slane %v1202_v59, 1 }
 0x2f5   : > { %v1204_v27 = vadd.f32 %v1203_v26, %v1202_v59 }
 0x2f7   : > { %1571 = vpush %v1204_v27 }
 0x320   : > { %s1570_s25 = spop %1569 }
 0x321   : > { %s2542_s14 = smul.f32 %s1570_s25, %s2181_s28  ;;  %s2591_s25 = scalar_lea.vmem [#allocation12], %s1549_s1 }
 0x322   : > { %s1560_s1 = sshll.u32 %s1961_s2, 6 }
 0x323   : > { %s1215_s6 = smul.f32 %s2542_s14, %s2542_s14  ;;  %v2551_v15 = vstv %s2542_s14 }
 0x324   : > { %v1231_v59 = vsub.f32 %v2417_v16, %v2551_v15  ;;  %v1232_v26 = vsub.f32 %v2419_v46, %v2551_v15  ;;  %v1233_v4 = vsub.f32 %v2442_v49, %v2551_v15  ;;  %v1234_v28 = vsub.f32 %v2450_v43, %v2551_v15 }
 0x325   : > { %v1235_v48 = vsub.f32 %v2458_v36, %v2551_v15  ;;  %v1236_v18 = vsub.f32 %v2466_v35, %v2551_v15  ;;  %v1237_v49 = vsub.f32 %v2474_v2, %v2551_v15  ;;  %v1238_v43 = vsub.f32 %v2482_v52, %v2551_v15 }
 0x326   : > { %v1239_v36 = vsub.f32 %v2490_v17, %v2551_v15  ;;  %v1240_v35 = vsub.f32 %v2498_v34, %v2551_v15  ;;  %v1241_v2 = vsub.f32 %v2505_v14, %v2551_v15  ;;  %v1242_v52 = vsub.f32 %v2512_v54, %v2551_v15 }
 0x327   : > { %v1243_v17 = vsub.f32 %v2518_v21, %v2551_v15  ;;  %v1244_v34 = vsub.f32 %v2524_v7, %v2551_v15  ;;  %v1245_v54 = vsub.f32 %v2529_v61, %v2551_v15  ;;  %v1246_v29 = vsub.f32 %v2534_v23, %v2551_v15  ;;  %v1666_v15 = vld [vmem:[%s2061_s23 + $0x8] sm:$0xff] }
 0x328   : > { %s1572_s24 = spop %1571 }
 0x329   : > { %s1214_s27 = smul.f32 %s1572_s24, %s2181_s28  ;;  %s1433_s24 = scalar_lea.hbm %s2652_s10, %s1560_s1 }
 0x32b   : > { %s1216_s29 = ssub.f32 %s1214_s27, %s1215_s6  ;;  %s1434_s27 = sshll.u32 %s2591_s25, 4  ;;  %s1435_s27 = int_to_ptr.vmem [resolvable:$true] %s1434_s27 }
 0x32d   : > { %s1217_s13 = sadd.f32 1e-08, %s1216_s29  ;;  %s1436_s29 = sshll.u32 %s1433_s24, 4  ;;  %s1437_s29 = int_to_ptr.hbm [resolvable:$true] %s1436_s29 }
 0x32e   : > { %s1807_s2 = sshra.s32 %s1437_s29, 4  ;;  %s1808_s2 = int_to_ptr.hbm [resolvable:$true] %s1807_s2 }
 0x32f   : > { %v1218_v57 = vstv %s1217_s13  ;;  %s1422_s13 = scalar_lea.sflag [#allocation6], %s2055_s16  ;;  %s1809_s28 = scalar_lea.hbm %s1808_s2, 64 }
 0x330   : > { %1663 = vrsqrt.f32 %v1218_v57  ;;  %vm1225_vm9 = vweird.f32 %v1218_v57  ;;  %p1810_p1 = scmp.ne.s32.totalorder %s1808_s2, %s1809_s28  ;;  %p1814_p11 = scmp.lt.s32.totalorder %s1808_s2, %s2652_s10 }
 0x331   : > { %p1815_p9 = scmp.lt.s32.totalorder %s1813_s26, %s1809_s28 }
 0x332   : > { %p1811_p4 = pnand %p1810_p1, %p2025_p3 }
 0x333   : > { %p1816_p2 = por %p1815_p9, %p1814_p11 }
 0x334   : > { %p1812_p8 = pneg %p1811_p4 }
 0x336   : > { %v1664_v22 = vpop.eup %1663  ;;  %p1817_p10 = pnand %p1816_p2, %p1812_p8 }
 0x337   : > { %v1220_v47 = vmul.f32 %v1664_v22, %v1218_v57  ;;  %vm1226_vm8 = vweird.f32 %v1664_v22 }
 0x338   : > { %vm1227_vm10 = vmor %vm1225_vm9, %vm1226_vm8 }
 0x339   : > { %v1221_v10 = vmul.f32 %v1664_v22, %v1220_v47 }
 0x33b   : > { %v1222_v40 = vmul.f32 0.5, %v1221_v10 }
 0x33d   : > { %v1223_v55 = vsub.f32 1.5, %v1222_v40 }
 0x33f   : > { %v1224_v63 = vmul.f32 %v1664_v22, %v1223_v55 }
 0x341   : > { %v1228_v50 = vsel %vm1227_vm10, %v1664_v22, %v1224_v63 }
 0x342   : > { %1573 = vpush %v1228_v50 }
 0x373   : > { %s1574_s21 = spop %1573 }
 0x374   : > { %v1247_v32 = vstv %s1574_s21 }
 0x375   : > { %v1248_v45 = vmul.f32 %v1247_v32, %v1131_v25 }
 0x377   : > { %v1250_v27 = vperm.slane %v1248_v45, 0  ;;  %v1251_v5 = vperm.slane %v1248_v45, 1 }
 0x379   : > { %v1254_v19 = vmul.f32 %v1250_v27, %v1231_v59  ;;  %v1255_v42 = vmul.f32 %v1251_v5, %v1232_v26  ;;  %v1256_v16 = vmul.f32 %v1250_v27, %v1233_v4  ;;  %v1257_v41 = vmul.f32 %v1251_v5, %v1234_v28  ;;  %v1667_v26 = vld [vmem:[%s2061_s23 + $0x10] sm:$0xff]  ;;  %v1669_v28 = vld [vmem:[%s2061_s23 + $0x20] sm:$0xff] }
 0x37a   : > { %v1258_v53 = vmul.f32 %v1250_v27, %v1235_v48  ;;  %v1259_v1 = vmul.f32 %v1251_v5, %v1236_v18  ;;  %v1260_v58 = vmul.f32 %v1250_v27, %v1237_v49  ;;  %v1261_v60 = vmul.f32 %v1251_v5, %v1238_v43  ;;  %v1670_v48 = vld [vmem:[%s2061_s23 + $0x28] sm:$0xff] }
 0x37b   : > { %v1275_v13 = vadd.f32 %v1271_v44, %v1254_v19  ;;  %v1276_v0 = vadd.f32 %v1272_v9, %v1255_v42  ;;  %v1277_v31 = vadd.f32 %v1271_v44, %v1256_v16  ;;  %v1278_v46 = vadd.f32 %v1272_v9, %v1257_v41  ;;  %v1668_v19 = vld [vmem:[%s2061_s23 + $0x18] sm:$0xff] }
 0x37c   : > { %v1279_v56 = vadd.f32 %v1271_v44, %v1258_v53  ;;  %v1280_v57 = vadd.f32 %v1272_v9, %v1259_v1  ;;  %v1281_v3 = vadd.f32 %v1271_v44, %v1260_v58  ;;  %v1282_v6 = vadd.f32 %v1272_v9, %v1261_v60 }
 0x37d   : > { %1339 = vmatmul.f32.vlgmr.msra.gmra.mxu2 %v1275_v13  ;;  %1380 = vmatmul.f32.vlgmr.msra.gmra.mxu3 %v1276_v0  ;;  %v1262_v37 = vmul.f32 %v1250_v27, %v1239_v36  ;;  %v1263_v38 = vmul.f32 %v1251_v5, %v1240_v35  ;;  %v1264_v10 = vmul.f32 %v1250_v27, %v1241_v2 }
 0x37e   : > { %v1265_v40 = vmul.f32 %v1251_v5, %v1242_v52  ;;  %v1266_v50 = vmul.f32 %v1250_v27, %v1243_v17  ;;  %v1267_v51 = vmul.f32 %v1251_v5, %v1244_v34  ;;  %v1268_v30 = vmul.f32 %v1250_v27, %v1245_v54 }
 0x37f   : > { %v1283_v22 = vadd.f32 %v1271_v44, %v1262_v37  ;;  %v1284_v47 = vadd.f32 %v1272_v9, %v1263_v38  ;;  %v1285_v55 = vadd.f32 %v1271_v44, %v1264_v10  ;;  %v1269_v21 = vmul.f32 %v1251_v5, %v1246_v29 }
 0x380   : > { %v1286_v63 = vadd.f32 %v1272_v9, %v1265_v40  ;;  %v1287_v39 = vadd.f32 %v1271_v44, %v1266_v50  ;;  %v1288_v14 = vadd.f32 %v1272_v9, %v1267_v51  ;;  %v1289_v24 = vadd.f32 %v1271_v44, %v1268_v30 }
 0x381   : > { %v1290_v8 = vadd.f32 %v1272_v9, %v1269_v21 }
 0x385   : > { %1342 = vmatmul.f32.gmra.mxu2 %v1277_v31  ;;  %1383 = vmatmul.f32.gmra.mxu3 %v1278_v46 }
 0x38d   : > { %1345 = vmatmul.f32.gmra.mxu2 %v1279_v56  ;;  %1386 = vmatmul.f32.gmra.mxu3 %v1280_v57  ;;  %v1671_v57 = vld [vmem:[%s2061_s23 + $0x30] sm:$0xff] }
 0x395   : > { %1348 = vmatmul.f32.gmra.mxu2 %v1281_v3  ;;  %1389 = vmatmul.f32.gmra.mxu3 %v1282_v6  ;;  %v1672_v3 = vld [vmem:[%s2061_s23 + $0x38] sm:$0xff] }
 0x39d   : > { %1351 = vmatmul.f32.gmra.mxu2 %v1283_v22  ;;  %1392 = vmatmul.f32.gmra.mxu3 %v1284_v47 }
 0x3a5   : > { %1354 = vmatmul.f32.gmra.mxu2 %v1285_v55  ;;  %1395 = vmatmul.f32.gmra.mxu3 %v1286_v63 }
 0x3ad   : > { %1357 = vmatmul.f32.gmra.mxu2 %v1287_v39  ;;  %1398 = vmatmul.f32.gmra.mxu3 %v1288_v14 }
 0x3b5   : > { %1360 = vmatmul.f32.gmra.mxu2 %v1289_v24  ;;  %1401 = vmatmul.f32.gmra.mxu3 %v1290_v8 }
 0x400   : > { %v1340_v7 = vpop.f32.mrf.mxu2  ;;  %v1381_v20 = vpop.f32.mrf.mxu3 }
 0x401   : > { %v1382_v62 = vadd.f32 %v1381_v20, %v1340_v7 }
 0x403   : > { %v1405_v11 = vadd.f32 %v1665_v12, %v1382_v62 }
 0x405   : > { %1413 = vst [vmem:[%s2591_s25] sm:$0xff] %v1405_v11 }
 0x408   : > { %v1343_v61 = vpop.f32.mrf.mxu2  ;;  %v1384_v23 = vpop.f32.mrf.mxu3 }
 0x409   : > { %v1385_v25 = vadd.f32 %v1384_v23, %v1343_v61 }
 0x40b   : > { %v1406_v32 = vadd.f32 %v1666_v15, %v1385_v25 }
 0x40d   : > { %1414 = vst [vmem:[%s2591_s25 + $0x8] sm:$0xff] %v1406_v32 }
 0x410   : > { %v1346_v33 = vpop.f32.mrf.mxu2  ;;  %v1387_v45 = vpop.f32.mrf.mxu3 }
 0x411   : > { %v1388_v59 = vadd.f32 %v1387_v45, %v1346_v33 }
 0x413   : > { %v1407_v27 = vadd.f32 %v1667_v26, %v1388_v59 }
 0x415   : > { %1415 = vst [vmem:[%s2591_s25 + $0x10] sm:$0xff] %v1407_v27 }
 0x418   : > { %v1349_v5 = vpop.f32.mrf.mxu2  ;;  %v1390_v44 = vpop.f32.mrf.mxu3 }
 0x419   : > { %v1391_v9 = vadd.f32 %v1390_v44, %v1349_v5 }
 0x41b   : > { %v1408_v42 = vadd.f32 %v1668_v19, %v1391_v9 }
 0x41d   : > { %1416 = vst [vmem:[%s2591_s25 + $0x18] sm:$0xff] %v1408_v42 }
 0x420   : > { %v1352_v13 = vpop.f32.mrf.mxu2  ;;  %v1393_v0 = vpop.f32.mrf.mxu3 }
 0x421   : > { %v1394_v4 = vadd.f32 %v1393_v0, %v1352_v13 }
 0x423   : > { %v1409_v16 = vadd.f32 %v1669_v28, %v1394_v4 }
 0x425   : > { %1417 = vst [vmem:[%s2591_s25 + $0x20] sm:$0xff] %v1409_v16 }
 0x428   : > { %v1355_v41 = vpop.f32.mrf.mxu2  ;;  %v1396_v31 = vpop.f32.mrf.mxu3 }
 0x429   : > { %v1397_v46 = vadd.f32 %v1396_v31, %v1355_v41 }
 0x42b   : > { %v1410_v18 = vadd.f32 %v1670_v48, %v1397_v46 }
 0x42d   : > { %1418 = vst [vmem:[%s2591_s25 + $0x28] sm:$0xff] %v1410_v18 }
 0x430   : > { %v1358_v53 = vpop.f32.mrf.mxu2  ;;  %v1399_v1 = vpop.f32.mrf.mxu3 }
 0x431   : > { %v1400_v56 = vadd.f32 %v1399_v1, %v1358_v53 }
 0x433   : > { %v1411_v49 = vadd.f32 %v1671_v57, %v1400_v56 }
 0x435   : > { %1419 = vst [vmem:[%s2591_s25 + $0x30] sm:$0xff] %v1411_v49 }
 0x438   : > { %v1361_v43 = vpop.f32.mrf.mxu2  ;;  %v1402_v58 = vpop.f32.mrf.mxu3 }
 0x439   : > { %v1403_v60 = vadd.f32 %v1402_v58, %v1361_v43 }
 0x43b   : > { %v1412_v6 = vadd.f32 %v1672_v3, %v1403_v60 }
 0x43d   : > { %1420 = vst [vmem:[%s2591_s25 + $0x38] sm:$0xff] %v1412_v6 }
 0x43e   : > { %1820 = shalt.err (!%p1817_p10)
}
 0x43f   : > { %s1877_s16 = smov 128   ;;  %s1878_s23 = smov 8  }
 0x440   : > { %1589 = dma.vmem_to_hbm [thread:$0]  (%p2025_p3), %s1435_s27, 1024, %s1437_s29, %s1422_s13, %s1877_s16, %s1877_s16, %s1878_s23  }
 0x441 PF: > { %s1451_s25 = sand.u32 1, %s1855_s17   ;;  %p2667_p12 = scmp.ge.s32.totalorder %s1867_s20, 2 }
 0x442   : > { %s1452_s14 = scalar_lea.sflag [#allocation6], %s1451_s25 }
 0x443   : > { %p1606_p13 = pnand %p2667_p12, %p1975_p6 }
 0x445   : > { %p1607_p0 = pneg %p1606_p13 }
 0x447   : > { %1850 = dma.done.wait (%p1607_p0), %s1452_s14, 1024  }
 0x448   : > { %1852 = vsyncadd (%p1607_p0), %s1452_s14, 4294966272  ;;  %p27_p5 = scmp.ge.s32.totalorder %s2012_s11, 4   ;;  %s2668_s17 = smov %s1859_s18 }
 0x449   : > { %s2669_s18 = smov %s1863_s19  ;;  %s2670_s19 = smov %s2021_s12 }
 0x44a   : > { %s2671_s20 = smov %s2012_s11  ;;  %29 = sbr.rel (!%p27_p5) target bundleno = 12 (0xc), region = 119 }
 0x44f   :  { %1458 = vsyncpa [#allocation5], 1 }
 0x450   :  { %1460 = vsyncpa [#allocation5 + $0x1], 1 }
 0x451   :  { %1461 = vsyncpa [#allocation8], 1 }
 0x452   :  { %1462 = vsyncpa [#allocation11], 1 }
 0x453   :  { %1463 = vsyncpa [#allocation6], 1 }
 0x454   :  { %1465 = vsyncpa [#allocation6 + $0x1], 1 }

</bundles_post_ra>
